<compile_context>
chip_gen: v7x
topology: tpu7x:2x2x1
jax: 0.10.0
libtpu: 0.0.40
codegen_flags: <defaults>
</compile_context>

<pallas_src>
import jax
import jax.numpy as jnp
import numpy as np
from jax.experimental import pallas as pl
from jax.experimental.pallas import tpu as pltpu

L = 16  # sequence length; fixes LazyLinear in_features = L


def _round_up(x, m):
    return ((x + m - 1) // m) * m


def model_kernel(x_ref, w1_ref, b1_ref, w2_ref, b2_ref, w3_ref, b3_ref,
                 w4_ref, wlt_ref, bl_ref, o_ref):
    M = x_ref.shape[0]            # B_TILE * L rows in this tile
    bt = M // L                   # samples in this tile

    # Within-sample position of every flattened row -> cross-sample halo masks.
    pos = jax.lax.broadcasted_iota(jnp.int32, (M, 1), 0) % L
    first_row = pos == 0          # rows whose l-1 neighbour is out of sample
    last_row = pos == (L - 1)     # rows whose l+1 neighbour is out of sample

    def conv3_silu(h, w_ref, b_ref):
        # h: (M, Cin); w_ref: (3, Cin, Cout). SiLU(Conv1d(k=3, pad=1)) batched.
        cin = h.shape[1]
        zrow = jnp.zeros((1, cin), jnp.float32)
        h_prev = jnp.where(first_row, 0.0,
                           jnp.concatenate([zrow, h[:-1, :]], axis=0))
        h_next = jnp.where(last_row, 0.0,
                           jnp.concatenate([h[1:, :], zrow], axis=0))
        y = (jnp.dot(h_prev, w_ref[0], preferred_element_type=jnp.float32)
             + jnp.dot(h, w_ref[1], preferred_element_type=jnp.float32)
             + jnp.dot(h_next, w_ref[2], preferred_element_type=jnp.float32)
             + b_ref[...])
        return y * jax.nn.sigmoid(y)                       # SiLU

    # Layer 1: taps pre-packed in the wrapper -> single (M, 9) @ (9, 32) matmul.
    x = x_ref[...].astype(jnp.float32)
    h = jnp.dot(x, w1_ref[...], preferred_element_type=jnp.float32) + b1_ref[...]
    h = h * jax.nn.sigmoid(h)                              # (M, 32)

    h = conv3_silu(h, w2_ref, b2_ref)                      # (M, 64)
    h = conv3_silu(h, w3_ref, b3_ref)                      # (M, 128)

    # 1x1 conv (its bias is folded into bl in the wrapper) + Linear(L -> 2).
    z = jnp.dot(h, w4_ref[...], preferred_element_type=jnp.float32)   # (M, 1)
    p = z * wlt_ref[...]                                               # (M, 2)
    out = jnp.sum(p.reshape(bt, L, 2), axis=1) + bl_ref[...]           # (bt, 2)
    o_ref[...] = out


def run_model(x_nlc, params, b_tile=64):
    """x_nlc: (N, L, 3) float32. Returns (N, 1, 2), matching the PyTorch module."""
    w1, b1, w2, b2, w3, b3, w4, b4, wl, bl = params
    N, Lx, Cin = x_nlc.shape
    assert Lx == L and Cin == 3

    # Pad the batch to a multiple of the batch tile (padded rows sliced off).
    b_tile = min(b_tile, _round_up(N, 8))
    Np = _round_up(N, b_tile)
    if Np != N:
        x_nlc = jnp.pad(x_nlc, ((0, Np - N), (0, 0), (0, 0)))

    # Pre-build layer-1's 3-tap shifted-concat input: (Np*L, 9).
    xp = jnp.pad(x_nlc, ((0, 0), (1, 1), (0, 0)))
    x_tap = jnp.concatenate(
        [xp[:, 0:L, :], xp[:, 1:L + 1, :], xp[:, 2:L + 2, :]], axis=-1)
    x_tap = x_tap.reshape(Np * L, 3 * Cin)

    # Pack layer-1 weight (3,3,32) -> (9,32); tile Linear weight over the batch
    # tile rows; fold the 1x1-conv bias b4 into the Linear bias.
    w1p = w1.reshape(3 * Cin, w1.shape[-1])
    wlt = jnp.tile(wl, (b_tile, 1))                                # (b_tile*L, 2)
    bl_eff = bl + b4[0, 0] * jnp.sum(wl, axis=0, keepdims=True)    # (1, 2)

    consts = (w1p, b1, w2, b2, w3, b3, w4, wlt, bl_eff)

    def const_spec(a):
        nd = a.ndim
        return pl.BlockSpec(a.shape, lambda g, _nd=nd: (0,) * _nd)

    out = pl.pallas_call(
        model_kernel,
        out_shape=jax.ShapeDtypeStruct((Np, 2), jnp.float32),
        grid_spec=pltpu.PrefetchScalarGridSpec(
            num_scalar_prefetch=0,
            grid=(Np // b_tile,),
            in_specs=[pl.BlockSpec((b_tile * L, 3 * Cin), lambda g: (g, 0))]
                     + [const_spec(a) for a in consts],
            out_specs=pl.BlockSpec((b_tile, 2), lambda g: (g, 0)),
        ),
        compiler_params=pltpu.CompilerParams(
            dimension_semantics=("parallel",)),
    )(x_tap, *consts)

    return out[:N].reshape(N, 1, 2)


# ---------------- parameter init (deterministic, PyTorch-style bounds) -------
def init_params(key):
    ks = jax.random.split(key, 10)

    def conv_w(k, taps, cin, cout):
        bound = 1.0 / np.sqrt(cin * taps)
        return jax.random.uniform(k, (taps, cin, cout), jnp.float32, -bound, bound)

    def bias(k, cin, taps, cout):
        bound = 1.0 / np.sqrt(cin * taps)
        return jax.random.uniform(k, (1, cout), jnp.float32, -bound, bound)

    w1 = conv_w(ks[0], 3, 3, 32);    b1 = bias(ks[1], 3, 3, 32)
    w2 = conv_w(ks[2], 3, 32, 64);   b2 = bias(ks[3], 32, 3, 64)
    w3 = conv_w(ks[4], 3, 64, 128);  b3 = bias(ks[5], 64, 3, 128)
    w4 = conv_w(ks[6], 1, 128, 1)[0]  # (128, 1) -- 1x1 conv
    b4 = bias(ks[7], 128, 1, 1)
    # Linear(L, 2): stored transposed as (L, 2)
    bound = 1.0 / np.sqrt(L)
    wl = jax.random.uniform(ks[8], (L, 2), jnp.float32, -bound, bound)
    bl = jax.random.uniform(ks[9], (1, 2), jnp.float32, -bound, bound)
    return (w1, b1, w2, b2, w3, b3, w4, b4, wl, bl)


# ---------------- pure-JAX reference (same math, no Pallas) ------------------
def reference(x_nlc, params):
    w1, b1, w2, b2, w3, b3, w4, b4, wl, bl = params

    def conv3(x, w, b, silu=True):
        xp = jnp.pad(x, ((0, 0), (1, 1), (0, 0)))
        Ls = x.shape[1]
        y = (jnp.einsum('nlc,cd->nld', xp[:, 0:Ls], w[0])
             + jnp.einsum('nlc,cd->nld', xp[:, 1:Ls + 1], w[1])
             + jnp.einsum('nlc,cd->nld', xp[:, 2:Ls + 2], w[2]) + b)
        return y * jax.nn.sigmoid(y) if silu else y

    h = conv3(x_nlc, w1, b1)
    h = conv3(h, w2, b2)
    h = conv3(h, w3, b3)
    z = jnp.einsum('nlc,cd->nld', h, w4) + b4               # (N, L, 1)
    out = jnp.einsum('nl,lj->nj', z[..., 0], wl) + bl       # (N, 2)
    return out[:, None, :]                                  # (N, 1, 2)


if __name__ == "__main__":
    key = jax.random.PRNGKey(0)
    k_x, k_p = jax.random.split(key)

    N, C = 2, 3
    x_ncl = jax.random.normal(k_x, (N, C, L), jnp.float32)   # PyTorch NCL input
    x_nlc = jnp.transpose(x_ncl, (0, 2, 1))                  # kernel layout NLC

    params = init_params(k_p)

    out = run_model(x_nlc, params)
    out = jax.block_until_ready(out)

    ref = jax.block_until_ready(reference(x_nlc, params))
    np.testing.assert_allclose(np.asarray(out), np.asarray(ref),
                               rtol=5e-4, atol=1e-5)

    assert out.shape == (N, 1, 2)
    print("KERNEL_OK")
</pallas_src>

<mosaic_0001>
module attributes {stable_mosaic.version = 11 : i64} {
  func.func @model_kernel(%arg0: i32, %arg1: memref<128x9xf32, #tpu.memory_space<vmem>>, %arg2: memref<9x32xf32, #tpu.memory_space<vmem>>, %arg3: memref<1x32xf32, #tpu.memory_space<vmem>>, %arg4: memref<3x32x64xf32, #tpu.memory_space<vmem>>, %arg5: memref<1x64xf32, #tpu.memory_space<vmem>>, %arg6: memref<3x64x128xf32, #tpu.memory_space<vmem>>, %arg7: memref<1x128xf32, #tpu.memory_space<vmem>>, %arg8: memref<128x1xf32, #tpu.memory_space<vmem>>, %arg9: memref<128x2xf32, #tpu.memory_space<vmem>>, %arg10: memref<1x2xf32, #tpu.memory_space<vmem>>, %arg11: memref<8x2xf32, #tpu.memory_space<vmem>>) attributes {dimension_semantics = [#tpu.dimension_semantics<parallel>], iteration_bounds = array<i64: 1>, scalar_prefetch = 0 : i64, scratch_operands = 0 : i64, tpu.core_type = #tpu.core_type<tc>, window_params = [{transform_indices = @transform_0, window_bounds = array<i64: 128, 9>}, {pipeline_mode = #tpu.pipeline_mode<synchronous>, transform_indices = @transform_1, window_bounds = array<i64: 9, 32>}, {pipeline_mode = #tpu.pipeline_mode<synchronous>, transform_indices = @transform_2, window_bounds = array<i64: 1, 32>}, {pipeline_mode = #tpu.pipeline_mode<synchronous>, transform_indices = @transform_3, window_bounds = array<i64: 3, 32, 64>}, {pipeline_mode = #tpu.pipeline_mode<synchronous>, transform_indices = @transform_4, window_bounds = array<i64: 1, 64>}, {pipeline_mode = #tpu.pipeline_mode<synchronous>, transform_indices = @transform_5, window_bounds = array<i64: 3, 64, 128>}, {pipeline_mode = #tpu.pipeline_mode<synchronous>, transform_indices = @transform_6, window_bounds = array<i64: 1, 128>}, {pipeline_mode = #tpu.pipeline_mode<synchronous>, transform_indices = @transform_7, window_bounds = array<i64: 128, 1>}, {pipeline_mode = #tpu.pipeline_mode<synchronous>, transform_indices = @transform_8, window_bounds = array<i64: 128, 2>}, {pipeline_mode = #tpu.pipeline_mode<synchronous>, transform_indices = @transform_9, window_bounds = array<i64: 1, 2>}, {transform_indices = @transform_10, window_bounds = array<i64: 8, 2>}]} {
    %0 = tpu.iota {dimensions = array<i32: 0>} : vector<128x1xi32>
    %c16_i32 = arith.constant 16 : i32
    %c0_i32 = arith.constant 0 : i32
    %1 = arith.cmpi eq, %c16_i32, %c0_i32 : i32
    %c1_i32 = arith.constant 1 : i32
    %2 = arith.select %1, %c1_i32, %c16_i32 : i32
    %3 = vector.broadcast %2 : i32 to vector<128x1xi32>
    %4 = arith.remsi %0, %3 : vector<128x1xi32>
    %c0_i32_0 = arith.constant 0 : i32
    %5 = vector.broadcast %c0_i32_0 : i32 to vector<128x1xi32>
    %6 = arith.cmpi ne, %4, %5 : vector<128x1xi32>
    %c0_i32_1 = arith.constant 0 : i32
    %7 = vector.broadcast %c0_i32_1 : i32 to vector<128x1xi32>
    %8 = arith.cmpi slt, %4, %7 : vector<128x1xi32>
    %c0_i32_2 = arith.constant 0 : i32
    %9 = arith.cmpi slt, %2, %c0_i32_2 : i32
    %10 = vector.broadcast %9 : i1 to vector<128x1xi1>
    %11 = vector.broadcast %10 : vector<128x1xi1> to vector<128x1xi1>
    %12 = arith.xori %8, %11 : vector<128x1xi1>
    %13 = arith.andi %12, %6 : vector<128x1xi1>
    %14 = vector.broadcast %2 : i32 to vector<128x1xi32>
    %15 = arith.addi %4, %14 : vector<128x1xi32>
    %16 = arith.select %13, %15, %4 : vector<128x1xi1>, vector<128x1xi32>
    %c0_i32_3 = arith.constant 0 : i32
    %17 = vector.broadcast %c0_i32_3 : i32 to vector<128x1xi32>
    %18 = arith.cmpi eq, %16, %17 : vector<128x1xi32>
    %c15_i32 = arith.constant 15 : i32
    %19 = vector.broadcast %c15_i32 : i32 to vector<128x1xi32>
    %20 = arith.cmpi eq, %16, %19 : vector<128x1xi32>
    %c0 = arith.constant 0 : index
    %c0_4 = arith.constant 0 : index
    %21 = vector.load %arg1[%c0, %c0_4] : memref<128x9xf32, #tpu.memory_space<vmem>>, vector<128x9xf32>
    %c0_5 = arith.constant 0 : index
    %c0_6 = arith.constant 0 : index
    %22 = vector.load %arg2[%c0_5, %c0_6] : memref<9x32xf32, #tpu.memory_space<vmem>>, vector<9x32xf32>
    %cst = arith.constant dense<0.000000e+00> : vector<128x32xf32>
    %23 = tpu.matmul %21, %22, %cst {dimension_numbers = #tpu.dot_dimension_numbers<[1], [0], [0], [1], [0, 0, 1, 1], [], []>} : vector<128x9xf32>, vector<9x32xf32>, vector<128x32xf32> -> vector<128x32xf32>
    %c0_7 = arith.constant 0 : index
    %c0_8 = arith.constant 0 : index
    %24 = vector.load %arg3[%c0_7, %c0_8] : memref<1x32xf32, #tpu.memory_space<vmem>>, vector<1x32xf32>
    %25 = vector.broadcast %24 : vector<1x32xf32> to vector<128x32xf32>
    %26 = arith.addf %23, %25 : vector<128x32xf32>
    %27 = arith.negf %26 : vector<128x32xf32>
    %28 = math.exp %27 : vector<128x32xf32>
    %cst_9 = arith.constant 1.000000e+00 : f32
    %29 = vector.broadcast %cst_9 : f32 to vector<128x32xf32>
    %30 = arith.addf %29, %28 : vector<128x32xf32>
    %31 = arith.divf %29, %30 : vector<128x32xf32>
    %32 = arith.mulf %26, %31 : vector<128x32xf32>
    %cst_10 = arith.constant 0.000000e+00 : f32
    %33 = vector.broadcast %cst_10 : f32 to vector<1x32xf32>
    %34 = vector.extract_strided_slice %32 {offsets = [0, 0], sizes = [127, 32], strides = [1, 1]} : vector<128x32xf32> to vector<127x32xf32>
    %35 = tpu.concatenate %33, %34 in 0 : vector<1x32xf32>, vector<127x32xf32> -> vector<128x32xf32>
    %cst_11 = arith.constant 0.000000e+00 : f32
    %36 = vector.shape_cast %18 : vector<128x1xi1> to vector<128x1xi1>
    %37 = vector.broadcast %36 : vector<128x1xi1> to vector<128x32xi1>
    %38 = vector.broadcast %cst_11 : f32 to vector<128x32xf32>
    %39 = arith.select %37, %38, %35 : vector<128x32xi1>, vector<128x32xf32>
    %40 = vector.extract_strided_slice %32 {offsets = [1, 0], sizes = [127, 32], strides = [1, 1]} : vector<128x32xf32> to vector<127x32xf32>
    %41 = tpu.concatenate %40, %33 in 0 : vector<127x32xf32>, vector<1x32xf32> -> vector<128x32xf32>
    %cst_12 = arith.constant 0.000000e+00 : f32
    %42 = vector.shape_cast %20 : vector<128x1xi1> to vector<128x1xi1>
    %43 = vector.broadcast %42 : vector<128x1xi1> to vector<128x32xi1>
    %44 = vector.broadcast %cst_12 : f32 to vector<128x32xf32>
    %45 = arith.select %43, %44, %41 : vector<128x32xi1>, vector<128x32xf32>
    %c0_13 = arith.constant 0 : index
    %c0_14 = arith.constant 0 : index
    %c0_15 = arith.constant 0 : index
    %46 = vector.load %arg4[%c0_13, %c0_14, %c0_15] : memref<3x32x64xf32, #tpu.memory_space<vmem>>, vector<1x32x64xf32>
    %47 = vector.shape_cast %46 : vector<1x32x64xf32> to vector<32x64xf32>
    %cst_16 = arith.constant dense<0.000000e+00> : vector<128x64xf32>
    %48 = tpu.matmul %39, %47, %cst_16 {dimension_numbers = #tpu.dot_dimension_numbers<[1], [0], [0], [1], [0, 0, 1, 1], [], []>} : vector<128x32xf32>, vector<32x64xf32>, vector<128x64xf32> -> vector<128x64xf32>
    %c1 = arith.constant 1 : index
    %c0_17 = arith.constant 0 : index
    %c0_18 = arith.constant 0 : index
    %49 = vector.load %arg4[%c1, %c0_17, %c0_18] : memref<3x32x64xf32, #tpu.memory_space<vmem>>, vector<1x32x64xf32>
    %50 = vector.shape_cast %49 : vector<1x32x64xf32> to vector<32x64xf32>
    %cst_19 = arith.constant dense<0.000000e+00> : vector<128x64xf32>
    %51 = tpu.matmul %32, %50, %cst_19 {dimension_numbers = #tpu.dot_dimension_numbers<[1], [0], [0], [1], [0, 0, 1, 1], [], []>} : vector<128x32xf32>, vector<32x64xf32>, vector<128x64xf32> -> vector<128x64xf32>
    %52 = arith.addf %48, %51 : vector<128x64xf32>
    %c2 = arith.constant 2 : index
    %c0_20 = arith.constant 0 : index
    %c0_21 = arith.constant 0 : index
    %53 = vector.load %arg4[%c2, %c0_20, %c0_21] : memref<3x32x64xf32, #tpu.memory_space<vmem>>, vector<1x32x64xf32>
    %54 = vector.shape_cast %53 : vector<1x32x64xf32> to vector<32x64xf32>
    %cst_22 = arith.constant dense<0.000000e+00> : vector<128x64xf32>
    %55 = tpu.matmul %45, %54, %cst_22 {dimension_numbers = #tpu.dot_dimension_numbers<[1], [0], [0], [1], [0, 0, 1, 1], [], []>} : vector<128x32xf32>, vector<32x64xf32>, vector<128x64xf32> -> vector<128x64xf32>
    %56 = arith.addf %52, %55 : vector<128x64xf32>
    %c0_23 = arith.constant 0 : index
    %c0_24 = arith.constant 0 : index
    %57 = vector.load %arg5[%c0_23, %c0_24] : memref<1x64xf32, #tpu.memory_space<vmem>>, vector<1x64xf32>
    %58 = vector.broadcast %57 : vector<1x64xf32> to vector<128x64xf32>
    %59 = arith.addf %56, %58 : vector<128x64xf32>
    %60 = arith.negf %59 : vector<128x64xf32>
    %61 = math.exp %60 : vector<128x64xf32>
    %cst_25 = arith.constant 1.000000e+00 : f32
    %62 = vector.broadcast %cst_25 : f32 to vector<128x64xf32>
    %63 = arith.addf %62, %61 : vector<128x64xf32>
    %64 = arith.divf %62, %63 : vector<128x64xf32>
    %65 = arith.mulf %59, %64 : vector<128x64xf32>
    %cst_26 = arith.constant 0.000000e+00 : f32
    %66 = vector.broadcast %cst_26 : f32 to vector<1x64xf32>
    %67 = vector.extract_strided_slice %65 {offsets = [0, 0], sizes = [127, 64], strides = [1, 1]} : vector<128x64xf32> to vector<127x64xf32>
    %68 = tpu.concatenate %66, %67 in 0 : vector<1x64xf32>, vector<127x64xf32> -> vector<128x64xf32>
    %cst_27 = arith.constant 0.000000e+00 : f32
    %69 = vector.shape_cast %18 : vector<128x1xi1> to vector<128x1xi1>
    %70 = vector.broadcast %69 : vector<128x1xi1> to vector<128x64xi1>
    %71 = vector.broadcast %cst_27 : f32 to vector<128x64xf32>
    %72 = arith.select %70, %71, %68 : vector<128x64xi1>, vector<128x64xf32>
    %73 = vector.extract_strided_slice %65 {offsets = [1, 0], sizes = [127, 64], strides = [1, 1]} : vector<128x64xf32> to vector<127x64xf32>
    %74 = tpu.concatenate %73, %66 in 0 : vector<127x64xf32>, vector<1x64xf32> -> vector<128x64xf32>
    %cst_28 = arith.constant 0.000000e+00 : f32
    %75 = vector.shape_cast %20 : vector<128x1xi1> to vector<128x1xi1>
    %76 = vector.broadcast %75 : vector<128x1xi1> to vector<128x64xi1>
    %77 = vector.broadcast %cst_28 : f32 to vector<128x64xf32>
    %78 = arith.select %76, %77, %74 : vector<128x64xi1>, vector<128x64xf32>
    %c0_29 = arith.constant 0 : index
    %c0_30 = arith.constant 0 : index
    %c0_31 = arith.constant 0 : index
    %79 = vector.load %arg6[%c0_29, %c0_30, %c0_31] : memref<3x64x128xf32, #tpu.memory_space<vmem>>, vector<1x64x128xf32>
    %80 = vector.shape_cast %79 : vector<1x64x128xf32> to vector<64x128xf32>
    %cst_32 = arith.constant dense<0.000000e+00> : vector<128x128xf32>
    %81 = tpu.matmul %72, %80, %cst_32 {dimension_numbers = #tpu.dot_dimension_numbers<[1], [0], [0], [1], [0, 0, 1, 1], [], []>} : vector<128x64xf32>, vector<64x128xf32>, vector<128x128xf32> -> vector<128x128xf32>
    %c1_33 = arith.constant 1 : index
    %c0_34 = arith.constant 0 : index
    %c0_35 = arith.constant 0 : index
    %82 = vector.load %arg6[%c1_33, %c0_34, %c0_35] : memref<3x64x128xf32, #tpu.memory_space<vmem>>, vector<1x64x128xf32>
    %83 = vector.shape_cast %82 : vector<1x64x128xf32> to vector<64x128xf32>
    %cst_36 = arith.constant dense<0.000000e+00> : vector<128x128xf32>
    %84 = tpu.matmul %65, %83, %cst_36 {dimension_numbers = #tpu.dot_dimension_numbers<[1], [0], [0], [1], [0, 0, 1, 1], [], []>} : vector<128x64xf32>, vector<64x128xf32>, vector<128x128xf32> -> vector<128x128xf32>
    %85 = arith.addf %81, %84 : vector<128x128xf32>
    %c2_37 = arith.constant 2 : index
    %c0_38 = arith.constant 0 : index
    %c0_39 = arith.constant 0 : index
    %86 = vector.load %arg6[%c2_37, %c0_38, %c0_39] : memref<3x64x128xf32, #tpu.memory_space<vmem>>, vector<1x64x128xf32>
    %87 = vector.shape_cast %86 : vector<1x64x128xf32> to vector<64x128xf32>
    %cst_40 = arith.constant dense<0.000000e+00> : vector<128x128xf32>
    %88 = tpu.matmul %78, %87, %cst_40 {dimension_numbers = #tpu.dot_dimension_numbers<[1], [0], [0], [1], [0, 0, 1, 1], [], []>} : vector<128x64xf32>, vector<64x128xf32>, vector<128x128xf32> -> vector<128x128xf32>
    %89 = arith.addf %85, %88 : vector<128x128xf32>
    %c0_41 = arith.constant 0 : index
    %c0_42 = arith.constant 0 : index
    %90 = vector.load %arg7[%c0_41, %c0_42] : memref<1x128xf32, #tpu.memory_space<vmem>>, vector<1x128xf32>
    %91 = vector.broadcast %90 : vector<1x128xf32> to vector<128x128xf32>
    %92 = arith.addf %89, %91 : vector<128x128xf32>
    %93 = arith.negf %92 : vector<128x128xf32>
    %94 = math.exp %93 : vector<128x128xf32>
    %cst_43 = arith.constant 1.000000e+00 : f32
    %95 = vector.broadcast %cst_43 : f32 to vector<128x128xf32>
    %96 = arith.addf %95, %94 : vector<128x128xf32>
    %97 = arith.divf %95, %96 : vector<128x128xf32>
    %98 = arith.mulf %92, %97 : vector<128x128xf32>
    %c0_44 = arith.constant 0 : index
    %c0_45 = arith.constant 0 : index
    %99 = vector.load %arg8[%c0_44, %c0_45] : memref<128x1xf32, #tpu.memory_space<vmem>>, vector<128x1xf32>
    %cst_46 = arith.constant dense<0.000000e+00> : vector<128x1xf32>
    %100 = tpu.matmul %98, %99, %cst_46 {dimension_numbers = #tpu.dot_dimension_numbers<[1], [0], [0], [1], [0, 0, 1, 1], [], []>} : vector<128x128xf32>, vector<128x1xf32>, vector<128x1xf32> -> vector<128x1xf32>
    %c0_47 = arith.constant 0 : index
    %c0_48 = arith.constant 0 : index
    %101 = vector.load %arg9[%c0_47, %c0_48] : memref<128x2xf32, #tpu.memory_space<vmem>>, vector<128x2xf32>
    %102 = vector.broadcast %100 : vector<128x1xf32> to vector<128x2xf32>
    %103 = arith.mulf %102, %101 : vector<128x2xf32>
    %104 = vector.shape_cast %103 : vector<128x2xf32> to vector<8x16x2xf32>
    %cst_49 = arith.constant dense<0.000000e+00> : vector<8x2xf32>
    %105 = vector.multi_reduction <add>, %104, %cst_49 [1] : vector<8x16x2xf32> to vector<8x2xf32>
    %c0_50 = arith.constant 0 : index
    %c0_51 = arith.constant 0 : index
    %106 = vector.load %arg10[%c0_50, %c0_51] : memref<1x2xf32, #tpu.memory_space<vmem>>, vector<1x2xf32>
    %107 = vector.broadcast %106 : vector<1x2xf32> to vector<8x2xf32>
    %108 = arith.addf %105, %107 : vector<8x2xf32>
    %c0_52 = arith.constant 0 : index
    %c0_53 = arith.constant 0 : index
    %109 = vector.load %arg11[%c0_52, %c0_53] : memref<8x2xf32, #tpu.memory_space<vmem>>, vector<8x2xf32>
    tpu.vector_store %arg11[%c0_52, %c0_53], %108 {strides = array<i32>} : memref<8x2xf32, #tpu.memory_space<vmem>>, vector<8x2xf32>,
    return
  }
  func.func @transform_0(%arg0: i32) -> (i32, i32) {
    %c0_i32 = arith.constant 0 : i32
    %c0_i32_0 = arith.constant 0 : i32
    return %arg0, %c0_i32 : i32, i32
  }
  func.func @transform_1(%arg0: i32) -> (i32, i32) {
    %c0_i32 = arith.constant 0 : i32
    %c0_i32_0 = arith.constant 0 : i32
    %c0_i32_1 = arith.constant 0 : i32
    return %c0_i32, %c0_i32_0 : i32, i32
  }
  func.func @transform_2(%arg0: i32) -> (i32, i32) {
    %c0_i32 = arith.constant 0 : i32
    %c0_i32_0 = arith.constant 0 : i32
    %c0_i32_1 = arith.constant 0 : i32
    return %c0_i32, %c0_i32_0 : i32, i32
  }
  func.func @transform_3(%arg0: i32) -> (i32, i32, i32) {
    %c0_i32 = arith.constant 0 : i32
    %c0_i32_0 = arith.constant 0 : i32
    %c0_i32_1 = arith.constant 0 : i32
    %c0_i32_2 = arith.constant 0 : i32
    return %c0_i32, %c0_i32_0, %c0_i32_1 : i32, i32, i32
  }
  func.func @transform_4(%arg0: i32) -> (i32, i32) {
    %c0_i32 = arith.constant 0 : i32
    %c0_i32_0 = arith.constant 0 : i32
    %c0_i32_1 = arith.constant 0 : i32
    return %c0_i32, %c0_i32_0 : i32, i32
  }
  func.func @transform_5(%arg0: i32) -> (i32, i32, i32) {
    %c0_i32 = arith.constant 0 : i32
    %c0_i32_0 = arith.constant 0 : i32
    %c0_i32_1 = arith.constant 0 : i32
    %c0_i32_2 = arith.constant 0 : i32
    return %c0_i32, %c0_i32_0, %c0_i32_1 : i32, i32, i32
  }
  func.func @transform_6(%arg0: i32) -> (i32, i32) {
    %c0_i32 = arith.constant 0 : i32
    %c0_i32_0 = arith.constant 0 : i32
    %c0_i32_1 = arith.constant 0 : i32
    return %c0_i32, %c0_i32_0 : i32, i32
  }
  func.func @transform_7(%arg0: i32) -> (i32, i32) {
    %c0_i32 = arith.constant 0 : i32
    %c0_i32_0 = arith.constant 0 : i32
    %c0_i32_1 = arith.constant 0 : i32
    return %c0_i32, %c0_i32_0 : i32, i32
  }
  func.func @transform_8(%arg0: i32) -> (i32, i32) {
    %c0_i32 = arith.constant 0 : i32
    %c0_i32_0 = arith.constant 0 : i32
    %c0_i32_1 = arith.constant 0 : i32
    return %c0_i32, %c0_i32_0 : i32, i32
  }
  func.func @transform_9(%arg0: i32) -> (i32, i32) {
    %c0_i32 = arith.constant 0 : i32
    %c0_i32_0 = arith.constant 0 : i32
    %c0_i32_1 = arith.constant 0 : i32
    return %c0_i32, %c0_i32_0 : i32, i32
  }
  func.func @transform_10(%arg0: i32) -> (i32, i32) {
    %c0_i32 = arith.constant 0 : i32
    %c0_i32_0 = arith.constant 0 : i32
    return %arg0, %c0_i32 : i32, i32
  }
}

</mosaic_0001>

<bundles_post_ra>
// kernel: tpu_custom_call.1
= control target key start
LH: loop header
LB: loop body
LE: loop exit
PB: predicated region body
PF: predicated region fallthrough
CT: control target
= control target key end

     0   :  { %vm5018_vm0 = vcmask 1040384   ;;  %vm301_vm1 = vcmask 72704   ;;  %vm3871_vm2 = vmmov 1   ;;  %vm829_vm4 = vcmask 261120   ;;  %s5007_s1 = inlined_call_operand.vmem [shape: f32[9,32], index: 1, kind: input, shape index: {}]   ;;  %s5008_s0 = inlined_call_operand.vmem [shape: f32[128,9], index: 0, kind: input, shape index: {}]   ;;  %s5009_s3 = inlined_call_operand.vmem [shape: f32[3,32,64], index: 3, kind: input, shape index: {}]   ;;  %s5010_s2 = inlined_call_operand.vmem [shape: f32[1,32], index: 2, kind: input, shape index: {}]   ;;  %s5011_s5 = inlined_call_operand.vmem [shape: f32[3,64,128], index: 5, kind: input, shape index: {}]   ;;  %s5012_s4 = inlined_call_operand.vmem [shape: f32[1,64], index: 4, kind: input, shape index: {}]   ;;  %s5013_s7 = inlined_call_operand.vmem [shape: f32[128,1], index: 7, kind: input, shape index: {}]   ;;  %s5014_s6 = inlined_call_operand.vmem [shape: f32[1,128], index: 6, kind: input, shape index: {}]   ;;  %s5015_s8 = inlined_call_operand.vmem [shape: f32[128,2], index: 8, kind: input, shape index: {}]   ;;  %s5016_s9 = inlined_call_operand.vmem [shape: f32[1,2], index: 9, kind: input, shape index: {}]   ;;  %s5017_s10 = inlined_call_operand.vmem [shape: f32[8,2], index: 10, kind: output, shape index: {}]  }
   0x1   :  { %v292_v0 = vld [vmem:[%s5007_s1] sm:$0xff]  ;;  %v293_v1 = vld [vmem:[%s5007_s1 + $0x8] sm:$0x1]  ;;  %vm3502_vm3 = vmpackc.low %vm5018_vm0, %vm3871_vm2  ;;  %vm5019_vm5 = vcmask 1046528  }
   0x2   :  { %v3501_v2 = vpack.c.bf16 %v293_v1, %v292_v0  ;;  %v276_v3 = vld [vmem:[%s5008_s0] sm:$0xff]  ;;  %v277_v4 = vld [vmem:[%s5008_s0 + $0x8] sm:$0xff]  ;;  %v278_v5 = vld [vmem:[%s5008_s0 + $0x10] sm:$0xff] }
   0x3   :  { %3205 = vmatprep.mubr.msk.f32.mxu0 %vm301_vm1, %v276_v3  ;;  %v279_v6 = vld [vmem:[%s5008_s0 + $0x18] sm:$0xff]  ;;  %v280_v7 = vld [vmem:[%s5008_s0 + $0x20] sm:$0xff]  ;;  %v281_v8 = vld [vmem:[%s5008_s0 + $0x28] sm:$0xff] }
   0x4   :  { %3503 = vmatprep.subr.msk.bf16.mxu0 %vm3502_vm3, %v3501_v2  ;;  %v282_v9 = vld [vmem:[%s5008_s0 + $0x30] sm:$0xff]  ;;  %v283_v10 = vld [vmem:[%s5008_s0 + $0x38] sm:$0xff]  ;;  %v284_v11 = vld [vmem:[%s5008_s0 + $0x40] sm:$0xff] }
   0x5   :  { %3506 = vmatpush3.bf16.msk.msra.mxu0 %vm3502_vm3, %v3501_v2  ;;  %v285_v12 = vld [vmem:[%s5008_s0 + $0x48] sm:$0xff]  ;;  %v286_v13 = vld [vmem:[%s5008_s0 + $0x50] sm:$0xff]  ;;  %v287_v14 = vld [vmem:[%s5008_s0 + $0x58] sm:$0xff] }
   0x6   :  { %v288_v15 = vld [vmem:[%s5008_s0 + $0x60] sm:$0xff]  ;;  %v289_v16 = vld [vmem:[%s5008_s0 + $0x68] sm:$0xff]  ;;  %v290_v17 = vld [vmem:[%s5008_s0 + $0x70] sm:$0xff] }
   0x7   :  { %v291_v18 = vld [vmem:[%s5008_s0 + $0x78] sm:$0xff]  ;;  %v2864_v19 = vld [vmem:[%s5009_s3 + $0x20] sm:$0xff]  ;;  %v2865_v20 = vld [vmem:[%s5009_s3 + $0x28] sm:$0xff] }
   0x8   :  { %3206 = vmatmul.mubr.msk.f32.vlgmr.msra.gmra.mrb[0].mxu0 %vm301_vm1, %v277_v4  ;;  %v3507_v21 = vpack.c.bf16 %v2865_v20, %v2864_v19  ;;  %v2866_v22 = vld [vmem:[%s5009_s3 + $0x30] sm:$0xff]  ;;  %v2867_v23 = vld [vmem:[%s5009_s3 + $0x38] sm:$0xff]  ;;  %v820_v25 = vld [vmem:[%s5009_s3] sm:$0xff] }
   0x9   :  { %3208 = vmatprep.mubr.msk.f32.mxu0 %vm301_vm1, %v278_v5  ;;  %v3511_v24 = vpack.c.bf16 %v2867_v23, %v2866_v22  ;;  %v821_v26 = vld [vmem:[%s5009_s3 + $0x8] sm:$0xff]  ;;  %v4023_v28 = vld [vmem:[%s5010_s2] ss:$0 sm:$0xff]  ;;  %v822_v23 = vld [vmem:[%s5009_s3 + $0x10] sm:$0xff] }
   0xa   :  { %3508 = vmatprep.subr.bf16.mxu1 %v3507_v21  ;;  %v4017_v27 = vpack.c.bf16 %v821_v26, %v820_v25 }
   0xb   :  { %3510 = vmatpush3.bf16.msra.mxu1 %v3507_v21 }
   0xc   :  { %3209 = vmatmul.mubr.msk.f32.gmra.mrb[2].mxu0 %vm301_vm1, %v279_v6  ;;  %3512 = vmatprep.subr.bf16.mxu1 %v3511_v24 }
   0xd   :  { %3211 = vmatprep.mubr.msk.f32.mxu0 %vm301_vm1, %v280_v7 }
   0xf   :  { %3514 = vmatpush3.bf16.msra.mxu1 %v3511_v24  ;;  %v823_v24 = vld [vmem:[%s5009_s3 + $0x18] sm:$0xff] }
  0x10   :  { %3212 = vmatmul.mubr.msk.f32.gmra.mrb[4].mxu0 %vm301_vm1, %v281_v8  ;;  %3516 = vmatprep.subr.bf16.mxu1 %v4017_v27 }
  0x11   :  { %3214 = vmatprep.mubr.msk.f32.mxu0 %vm301_vm1, %v282_v9 }
  0x14   :  { %3215 = vmatmul.mubr.msk.f32.gmra.mrb[6].mxu0 %vm301_vm1, %v283_v10 }
  0x15   :  { %3217 = vmatprep.mubr.msk.f32.mxu0 %vm301_vm1, %v284_v11 }
  0x18   :  { %3218 = vmatmul.mubr.msk.f32.gmra.mrb[8].mxu0 %vm301_vm1, %v285_v12 }
  0x19   :  { %3220 = vmatprep.mubr.msk.f32.mxu0 %vm301_vm1, %v286_v13 }
  0x1c   :  { %3221 = vmatmul.mubr.msk.f32.gmra.mrb[10].mxu0 %vm301_vm1, %v287_v14 }
  0x1d   :  { %3223 = vmatprep.mubr.msk.f32.mxu0 %vm301_vm1, %v288_v15 }
  0x20   :  { %3224 = vmatmul.mubr.msk.f32.gmra.mrb[12].mxu0 %vm301_vm1, %v289_v16 }
  0x21   :  { %3226 = vmatprep.mubr.msk.f32.mxu0 %vm301_vm1, %v290_v17 }
  0x24   :  { %3227 = vmatmul.mubr.msk.f32.gmra.mrb[14].mxu0 %vm301_vm1, %v291_v18 }
  0xdb   :  { %v3207_v29 = vpop.f32.mrb[0].mxu0 }
  0xdc   :  { %v4026_v30 = vadd.f32 %v3207_v29, %v4023_v28  ;;  %v420_v31 = vpop.f32.mrb[1].mxu0 }
  0xdd   :  { %v4029_v32 = vadd.f32 %v4023_v28, %v420_v31 }
  0xde   :  { %v2849_v33 = vmul.f32 -1.442695, %v4026_v30 }
  0xdf   :  { %v2848_v34 = vmul.f32 -1.442695, %v4029_v32  ;;  %v3210_v35 = vpop.f32.mrb[2].mxu0 }
  0xe0   :  { %3679 = vpow2.f32 %v2849_v33  ;;  %v4034_v36 = vadd.f32 %v3210_v35, %v4023_v28  ;;  %v430_v37 = vpop.f32.mrb[3].mxu0 }
  0xe1   :  { %3681 = vpow2.f32 %v2848_v34  ;;  %v4037_v38 = vadd.f32 %v4023_v28, %v430_v37 }
  0xe2   :  { %v2851_v39 = vmul.f32 -1.442695, %v4034_v36 }
  0xe3   :  { %v2850_v40 = vmul.f32 -1.442695, %v4037_v38  ;;  %v3213_v41 = vpop.f32.mrb[4].mxu0 }
  0xe4   :  { %3683 = vpow2.f32 %v2851_v39  ;;  %v4042_v42 = vadd.f32 %v3213_v41, %v4023_v28  ;;  %v440_v43 = vpop.f32.mrb[5].mxu0  ;;  %v2900_v41 = vld [vmem:[%s5009_s3 + $0x40] sm:$0xff] }
  0xe5   :  { %3685 = vpow2.f32 %v2850_v40  ;;  %v4045_v44 = vadd.f32 %v4023_v28, %v440_v43  ;;  %v3519_v40 = vpack.c.bf16 %v823_v24, %v822_v23 }
  0xe6   :  { %v2853_v45 = vmul.f32 -1.442695, %v4042_v42 }
  0xe7   :  { %v2852_v46 = vmul.f32 -1.442695, %v4045_v44  ;;  %v3216_v47 = vpop.f32.mrb[6].mxu0 }
  0xe8   :  { %3687 = vpow2.f32 %v2853_v45  ;;  %v4050_v48 = vadd.f32 %v3216_v47, %v4023_v28  ;;  %v450_v49 = vpop.f32.mrb[7].mxu0 }
  0xe9   :  { %3689 = vpow2.f32 %v2852_v46  ;;  %v4053_v50 = vadd.f32 %v4023_v28, %v450_v49 }
  0xea   :  { %v3680_v51 = vpop.eup %3679  ;;  %v2855_v52 = vmul.f32 -1.442695, %v4050_v48 }
  0xeb   :  { %v3682_v53 = vpop.eup %3681  ;;  %v548_v54 = vadd.f32 1.0, %v3680_v51  ;;  %v2854_v55 = vmul.f32 -1.442695, %v4053_v50  ;;  %v3219_v56 = vpop.f32.mrb[8].mxu0 }
  0xec   :  { %v547_v57 = vadd.f32 1.0, %v3682_v53  ;;  %3691 = vpow2.f32 %v2855_v52  ;;  %v4058_v58 = vadd.f32 %v3219_v56, %v4023_v28  ;;  %v460_v59 = vpop.f32.mrb[9].mxu0 }
  0xed   :  { %3693 = vrcp.f32 %v548_v54  ;;  %v4061_v60 = vadd.f32 %v4023_v28, %v460_v59 }
  0xee   :  { %v3684_v61 = vpop.eup %3683  ;;  %3695 = vrcp.f32 %v547_v57  ;;  %v2857_v62 = vmul.f32 -1.442695, %v4058_v58 }
  0xef   :  { %v3686_v63 = vpop.eup %3685  ;;  %v550_v0 = vadd.f32 1.0, %v3684_v61  ;;  %3697 = vpow2.f32 %v2854_v55  ;;  %v2856_v1 = vmul.f32 -1.442695, %v4061_v60  ;;  %v3222_v2 = vpop.f32.mrb[10].mxu0 }
  0xf0   :  { %v549_v3 = vadd.f32 1.0, %v3686_v63  ;;  %3699 = vpow2.f32 %v2857_v62  ;;  %v4066_v4 = vadd.f32 %v3222_v2, %v4023_v28  ;;  %v470_v5 = vpop.f32.mrb[11].mxu0 }
  0xf1   :  { %3701 = vrcp.f32 %v550_v0  ;;  %v4069_v6 = vadd.f32 %v4023_v28, %v470_v5 }
  0xf2   :  { %v3688_v7 = vpop.eup %3687  ;;  %3703 = vrcp.f32 %v549_v3  ;;  %v2859_v8 = vmul.f32 -1.442695, %v4066_v4 }
  0xf3   :  { %v3690_v9 = vpop.eup %3689  ;;  %v552_v10 = vadd.f32 1.0, %v3688_v7  ;;  %3705 = vpow2.f32 %v2856_v1  ;;  %v2858_v11 = vmul.f32 -1.442695, %v4069_v6  ;;  %v3225_v12 = vpop.f32.mrb[12].mxu0 }
  0xf4   :  { %v551_v13 = vadd.f32 1.0, %v3690_v9  ;;  %3707 = vpow2.f32 %v2859_v8  ;;  %v4074_v14 = vadd.f32 %v3225_v12, %v4023_v28  ;;  %v480_v15 = vpop.f32.mrb[13].mxu0 }
  0xf5   :  { %3709 = vrcp.f32 %v552_v10  ;;  %v4077_v16 = vadd.f32 %v4023_v28, %v480_v15 }
  0xf6   :  { %v3692_v17 = vpop.eup %3691  ;;  %3711 = vrcp.f32 %v551_v13  ;;  %v2861_v18 = vmul.f32 -1.442695, %v4074_v14 }
  0xf7   :  { %v3694_v19 = vpop.eup %3693  ;;  %v554_v20 = vadd.f32 1.0, %v3692_v17  ;;  %3713 = vpow2.f32 %v2858_v11  ;;  %v2860_v21 = vmul.f32 -1.442695, %v4077_v16  ;;  %v3228_v22 = vpop.f32.mrb[14].mxu0 }
  0xf8   :  { %v3696_v25 = vpop.eup %3695  ;;  %v4088_v26 = vmul.f32 %v3694_v19, %v4026_v30  ;;  %3715 = vpow2.f32 %v2861_v18  ;;  %v4091_v29 = vadd.f32 %v3228_v22, %v4023_v28  ;;  %v490_v31 = vpop.f32.mrb[15].mxu0 }
  0xf9   :  { %v3698_v33 = vpop.eup %3697  ;;  %v4094_v34 = vmul.f32 %v3696_v25, %v4029_v32  ;;  %3717 = vrcp.f32 %v554_v20  ;;  %v4097_v35 = vadd.f32 %v4023_v28, %v490_v31  ;;  %v2901_v32 = vld [vmem:[%s5009_s3 + $0x48] sm:$0xff] }
  0xfa   :  { %v3700_v37 = vpop.eup %3699  ;;  %v725_v39 = vrot.slane %v4088_v26, 1  ;;  %v553_v30 = vadd.f32 1.0, %v3698_v33  ;;  %3719 = vpow2.f32 %v2860_v21  ;;  %v2863_v46 = vmul.f32 -1.442695, %v4091_v29 }
  0xfb   :  { %v3702_v43 = vpop.eup %3701  ;;  %v724_v45 = vrot.slane %v4094_v34, 1  ;;  %v556_v28 = vadd.f32 1.0, %v3700_v37  ;;  %v2862_v47 = vmul.f32 -1.442695, %v4097_v35  ;;  %3237 = vmatprep.mubr.msk.f32.mxu1 %vm829_vm4, %v4094_v34  ;;  %v628_v51 = vrot.slane %v4088_v26, 7 }
  0xfc   :  { %v3704_v49 = vpop.eup %3703  ;;  %v598_v52 = vmul.f32 %v3702_v43, %v4034_v36  ;;  %3721 = vrcp.f32 %v553_v30  ;;  %3238 = vmatmul.mubr.msk.f32.vlgmr.msra.gmra.mrb[0].mxu1 %vm829_vm4, %v4088_v26  ;;  %v627_v53 = vrot.slane %v4094_v34, 7  ;;  %v4121_v36 = vpack.c.bf16 %v2901_v32, %v2900_v41  ;;  %v2903_v34 = vld [vmem:[%s5009_s3 + $0x58] sm:$0xff] }
  0xfd   :  { %v3706_v54 = vpop.eup %3705  ;;  %v597_v55 = vmul.f32 %v3704_v49, %v4037_v38  ;;  %3723 = vrcp.f32 %v556_v28  ;;  %3518 = vmatpush3.bf16.msra.mxu1 %v4017_v27  ;;  %v4119_v56 = vsel %vm5019_vm5, %v724_v45, %v725_v39 }
  0xfe   :  { %v3708_v57 = vpop.eup %3707  ;;  %v632_v59 = vrot.slane %v598_v52, 7  ;;  %v555_v61 = vadd.f32 1.0, %v3706_v54  ;;  %3725 = vpow2.f32 %v2863_v46  ;;  %3520 = vmatprep.subr.bf16.mxu1 %v3519_v40  ;;  %v729_v63 = vrot.slane %v598_v52, 1 }
  0xff   :  { %v3710_v62 = vpop.eup %3709  ;;  %v630_v0 = vrot.slane %v597_v55, 7  ;;  %v558_v1 = vadd.f32 1.0, %v3708_v57  ;;  %3727 = vpow2.f32 %v2862_v47  ;;  %3240 = vmatprep.mubr.msk.f32.mxu1 %vm829_vm4, %v597_v55  ;;  %v727_v2 = vrot.slane %v597_v55, 1 }
 0x100   :  { %v3712_v38 = vpop.eup %3711  ;;  %v600_v27 = vmul.f32 %v3710_v62, %v4042_v42  ;;  %3729 = vrcp.f32 %v555_v61  ;;  %3241 = vmatmul.mubr.msk.f32.gmra.mrb[2].mxu1 %vm829_vm4, %v598_v52  ;;  %v4129_v3 = vsel %vm5018_vm0, %v627_v53, %v628_v51  ;;  %v35_v47 = vlaneseq }
 0x101   :  { %v3714_v5 = vpop.eup %3713  ;;  %v599_v7 = vmul.f32 %v3712_v38, %v4045_v44  ;;  %3731 = vrcp.f32 %v558_v1  ;;  %3522 = vmatpush3.bf16.msra.mxu1 %v3519_v40  ;;  %v4133_v8 = vsel %vm5018_vm0, %v628_v51, %v630_v0  ;;  %v4138_v18 = vsel %vm5018_vm0, %v630_v0, %v632_v59 }
 0x102   :  { %v3716_v9 = vpop.eup %3715  ;;  %v636_v10 = vrot.slane %v600_v27, 7  ;;  %v733_v11 = vrot.slane %v600_v27, 1  ;;  %v557_v42 = vadd.f32 1.0, %v3714_v5  ;;  %3524 = vmatprep.subr.bf16.mxu1 %v4121_v36  ;;  %v4143_v20 = vsel %vm5019_vm5, %v725_v39, %v727_v2 }
 0x103   :  { %v3718_v12 = vpop.eup %3717  ;;  %v634_v13 = vrot.slane %v599_v7, 7  ;;  %v731_v15 = vrot.slane %v599_v7, 1  ;;  %v560_v17 = vadd.f32 1.0, %v3716_v9  ;;  %3243 = vmatprep.mubr.msk.f32.mxu1 %vm829_vm4, %v599_v7  ;;  %v4146_v21 = vsel %vm5019_vm5, %v727_v2, %v729_v63 }
 0x104   :  { %v3720_v44 = vpop.eup %3719  ;;  %v602_v19 = vmul.f32 %v3718_v12, %v4050_v48  ;;  %3733 = vrcp.f32 %v557_v42  ;;  %3244 = vmatmul.mubr.msk.f32.gmra.mrb[4].mxu1 %vm829_vm4, %v600_v27  ;;  %v4180_v1 = vshrl.u32 %v35_v47, 7 }
 0x105   :  { %3735 = vrcp.f32 %v560_v17  ;;  %v559_v22 = vadd.f32 1.0, %v3720_v44  ;;  %v4149_v23 = vsel %vm5018_vm0, %v632_v59, %v634_v13  ;;  %v4152_v24 = vsel %vm5018_vm0, %v634_v13, %v636_v10 }
 0x106   :  { %v3722_v25 = vpop.eup %3721  ;;  %v640_v26 = vrot.slane %v602_v19, 7  ;;  %v4156_v33 = vsel %vm5019_vm5, %v729_v63, %v731_v15  ;;  %v4159_v37 = vsel %vm5019_vm5, %v731_v15, %v733_v11  ;;  %v737_v41 = vrot.slane %v602_v19, 1 }
 0x107   :  { %v3724_v48 = vpop.eup %3723  ;;  %v601_v31 = vmul.f32 %v3722_v25, %v4053_v50  ;;  %3737 = vrcp.f32 %v559_v22  ;;  %v56_v17 = vand.u32 15, %v4180_v1 }
 0x108   :  { %v3726_v39 = vpop.eup %3725  ;;  %v604_v30 = vmul.f32 %v3724_v48, %v4058_v58 }
 0x109   :  { %v3728_v40 = vpop.eup %3727  ;;  %v638_v32 = vrot.slane %v601_v31, 7  ;;  %v735_v43 = vrot.slane %v601_v31, 1  ;;  %v562_v45 = vadd.f32 1.0, %v3726_v39  ;;  %3246 = vmatprep.mubr.msk.f32.mxu1 %vm829_vm4, %v601_v31  ;;  %v40_v31 = vadd.s32 32, %v4180_v1 }
 0x10a   :  { %v3730_v28 = vpop.eup %3729  ;;  %v644_v46 = vrot.slane %v604_v30, 7  ;;  %v561_v50 = vadd.f32 1.0, %v3728_v40  ;;  %3247 = vmatmul.mubr.msk.f32.gmra.mrb[6].mxu1 %vm829_vm4, %v602_v19  ;;  %v741_v54 = vrot.slane %v604_v30, 1  ;;  %vm4225_vm6 = vcmp.eq.s32.totalorder %v56_v17, 0 }
 0x10b   :  { %v3732_v49 = vpop.eup %3731  ;;  %v603_v51 = vmul.f32 %v3730_v28, %v4061_v60  ;;  %3739 = vrcp.f32 %v562_v45  ;;  %v4166_v52 = vsel %vm5018_vm0, %v636_v10, %v638_v32  ;;  %v4169_v58 = vsel %vm5018_vm0, %v638_v32, %v640_v26  ;;  %v2982_v45 = vld [vmem:[%s5011_s5 + $0xa8] sm:$0xff] }
 0x10c   :  { %v606_v55 = vmul.f32 %v3732_v49, %v4066_v4  ;;  %3741 = vrcp.f32 %v561_v50  ;;  %v4173_v57 = vsel %vm5019_vm5, %v733_v11, %v735_v43  ;;  %v4177_v60 = vsel %vm5019_vm5, %v735_v43, %v737_v41 }
 0x10d   :  { %v642_v59 = vrot.slane %v603_v51, 7  ;;  %v739_v61 = vrot.slane %v603_v51, 1  ;;  %3249 = vmatprep.mubr.msk.f32.mxu1 %vm829_vm4, %v603_v51 }
 0x10e   :  { %v3734_v62 = vpop.eup %3733  ;;  %v648_v63 = vrot.slane %v606_v55, 7  ;;  %v745_v0 = vrot.slane %v606_v55, 1  ;;  %3250 = vmatmul.mubr.msk.f32.gmra.mrb[8].mxu1 %vm829_vm4, %v604_v30 }
 0x10f   :  { %v3736_v38 = vpop.eup %3735  ;;  %v605_v4 = vmul.f32 %v3734_v62, %v4069_v6  ;;  %v4184_v2 = vsel %vm5018_vm0, %v640_v26, %v642_v59  ;;  %v4187_v27 = vsel %vm5018_vm0, %v642_v59, %v644_v46  ;;  %v4190_v5 = vsel %vm5019_vm5, %v737_v41, %v739_v61 }
 0x110   :  { %v608_v7 = vmul.f32 %v3736_v38, %v4074_v14  ;;  %v4194_v9 = vsel %vm5019_vm5, %v739_v61, %v741_v54  ;;  %v38_v6 = vadd.s32 16, %v4180_v1 }
 0x111   :  { %v3738_v10 = vpop.eup %3737  ;;  %v646_v11 = vrot.slane %v605_v4, 7  ;;  %v743_v42 = vrot.slane %v605_v4, 1  ;;  %3252 = vmatprep.mubr.msk.f32.mxu1 %vm829_vm4, %v605_v4 }
 0x112   :  { %v652_v12 = vrot.slane %v608_v7, 7  ;;  %v749_v13 = vrot.slane %v608_v7, 1  ;;  %v607_v15 = vmul.f32 %v3738_v10, %v4077_v16  ;;  %3253 = vmatmul.mubr.msk.f32.gmra.mrb[10].mxu1 %vm829_vm4, %v606_v55  ;;  %v70_v48 = vand.u32 15, %v38_v6 }
 0x113   :  { %v4202_v14 = vsel %vm5018_vm0, %v644_v46, %v646_v11  ;;  %v4205_v44 = vsel %vm5018_vm0, %v646_v11, %v648_v63  ;;  %v4208_v19 = vsel %vm5019_vm5, %v741_v54, %v743_v42  ;;  %v4211_v22 = vsel %vm5019_vm5, %v743_v42, %v745_v0 }
 0x114   :  { %v650_v25 = vrot.slane %v607_v15, 7  ;;  %v747_v26 = vrot.slane %v607_v15, 1  ;;  %3255 = vmatprep.mubr.msk.f32.mxu1 %vm829_vm4, %v607_v15  ;;  %vm4248_vm7 = vcmp.eq.s32.totalorder %v70_v48, 0  ;;  %v84_v54 = vand.u32 15, %v40_v31 }
 0x115   :  { %v3740_v16 = vpop.eup %3739  ;;  %v42_v55 = vadd.s32 48, %v4180_v1  ;;  %v709_v38 = vsel %vm4248_vm7, 0.0, %v4133_v8  ;;  %v44_v10 = vadd.s32 64, %v4180_v1  ;;  %v46_v11 = vadd.s32 80, %v4180_v1 }
 0x116   :  { %v3742_v39 = vpop.eup %3741  ;;  %v4216_v30 = vmul.f32 %v3740_v16, %v4091_v29  ;;  %3256 = vmatmul.mubr.msk.f32.gmra.mrb[12].mxu1 %vm829_vm4, %v608_v7  ;;  %v651_v40 = vsel %vm5018_vm0, %v648_v63, %v650_v25  ;;  %v653_v41 = vsel %vm5018_vm0, %v650_v25, %v652_v12  ;;  %v4222_v32 = vsel %vm5019_vm5, %v745_v0, %v747_v26 }
 0x117   :  { %v609_v43 = vmul.f32 %v3742_v39, %v4097_v35  ;;  %v674_v29 = vsel %vm5018_vm0, 0.0, %v627_v53  ;;  %v4233_v28 = vsel %vm5019_vm5, %v747_v26, %v749_v13  ;;  %v2902_v35 = vld [vmem:[%s5009_s3 + $0x50] sm:$0xff]  ;;  %vm4271_vm8 = vcmp.eq.s32.totalorder %v84_v54, 0 }
 0x118   :  { %v656_v46 = vrot.slane %v4216_v30, 7  ;;  %v753_v50 = vrot.slane %v4216_v30, 1  ;;  %v707_v53 = vsel %vm4225_vm6, 0.0, %v674_v29  ;;  %v3527_v0 = vpack.c.bf16 %v2903_v34, %v2902_v35 }
 0x119   :  { %v654_v47 = vrot.slane %v609_v43, 7  ;;  %v751_v49 = vrot.slane %v609_v43, 1  ;;  %3258 = vmatprep.mubr.msk.f32.mxu1 %vm829_vm4, %v609_v43  ;;  %v98_v7 = vand.u32 15, %v42_v55  ;;  %v112_v8 = vand.u32 15, %v44_v10  ;;  %v2943_v10 = vld [vmem:[%s5011_s5 + $0x70] sm:$0xff] }
 0x11a   :  { %3259 = vmatmul.mubr.msk.f32.gmra.mrb[14].mxu1 %vm829_vm4, %v4216_v30  ;;  %v126_v42 = vand.u32 15, %v46_v11  ;;  %v48_v6 = vadd.s32 96, %v4180_v1  ;;  %v37_v25 = vadd.s32 8, %v4180_v1  ;;  %v39_v16 = vadd.s32 24, %v4180_v1  ;;  %v2939_v30 = vld [vmem:[%s5011_s5 + $0x50] sm:$0xff]  ;;  %v1693_v11 = vld [vmem:[%s5011_s5] sm:$0xff] }
 0x11b   :  { %3269 = vmatprep.mubr.msk.f32.mxu1 %vm829_vm4, %v707_v53  ;;  %v655_v59 = vsel %vm5018_vm0, %v652_v12, %v654_v47  ;;  %v657_v61 = vsel %vm5018_vm0, %v654_v47, %v656_v46  ;;  %v4257_v62 = vsel %vm5019_vm5, %v749_v13, %v751_v49  ;;  %v4262_v63 = vsel %vm5019_vm5, %v751_v49, %v753_v50 }
 0x11c   :  { %vm4282_vm9 = vcmp.eq.s32.totalorder %v98_v7, 0  ;;  %vm4293_vm10 = vcmp.eq.s32.totalorder %v112_v8, 0  ;;  %vm4304_vm11 = vcmp.eq.s32.totalorder %v126_v42, 0  ;;  %v140_v12 = vand.u32 15, %v48_v6  ;;  %v4459_v6 = vld [vmem:[%s5012_s4] ss:$0 sm:$0xff] }
 0x11d   :  { %v50_v13 = vadd.s32 112, %v4180_v1  ;;  %v63_v26 = vand.u32 15, %v37_v25  ;;  %v77_v48 = vand.u32 15, %v39_v16  ;;  %v41_v31 = vadd.s32 40, %v4180_v1 }
 0x11e   :  { %3270 = vmatmul.mubr.msk.f32.vlgmr.msra.gmra.mrb[0].mxu1 %vm829_vm4, %v4129_v3  ;;  %v711_v3 = vsel %vm4271_vm8, 0.0, %v4149_v23  ;;  %vm4315_vm12 = vcmp.eq.s32.totalorder %v140_v12, 0  ;;  %v43_v43 = vadd.s32 56, %v4180_v1  ;;  %v45_v46 = vadd.s32 72, %v4180_v1 }
 0x11f   :  { %3526 = vmatpush3.bf16.msra.mxu1 %v4121_v36  ;;  %3272 = vmatprep.mubr.msk.f32.mxu1 %vm829_vm4, %v709_v38  ;;  %v154_v15 = vand.u32 15, %v50_v13  ;;  %v719_v17 = vsel %vm4315_vm12, 0.0, %v651_v40  ;;  %vm4335_vm14 = vcmp.eq.s32.totalorder %v63_v26, 15  ;;  %vm4346_vm15 = vcmp.eq.s32.totalorder %v77_v48, 15  ;;  %v2942_v38 = vld [vmem:[%s5011_s5 + $0x68] sm:$0xff] }
 0x120   :  { %3528 = vmatprep.subr.bf16.mxu1 %v3527_v0  ;;  %v805_v39 = vsel %vm4335_vm14, 0.0, %v4143_v20  ;;  %v5046_v20 = vmov 0  ;;  %v105_v29 = vand.u32 15, %v43_v43  ;;  %v119_v47 = vand.u32 15, %v45_v46 }
 0x121   :  { %vm4325_vm13 = vcmp.eq.s32.totalorder %v154_v15, 0  ;;  %v47_v49 = vadd.s32 88, %v4180_v1  ;;  %v49_v34 = vadd.s32 104, %v4180_v1  ;;  %v51_v54 = vadd.s32 120, %v4180_v1 }
 0x122   :  { %3273 = vmatmul.mubr.msk.f32.gmra.mrb[2].mxu1 %vm829_vm4, %v4138_v18  ;;  %v713_v18 = vsel %vm4282_vm9, 0.0, %v4166_v52  ;;  %vm4368_vm2 = vcmp.eq.s32.totalorder %v105_v29, 15  ;;  %vm4379_vm3 = vcmp.eq.s32.totalorder %v119_v47, 15 }
 0x123   :  { %3275 = vmatprep.mubr.msk.f32.mxu1 %vm829_vm4, %v711_v3  ;;  %3530 = vmatpush3.bf16.msra.mxu1 %v3527_v0  ;;  %v133_v35 = vand.u32 15, %v47_v49  ;;  %v147_v53 = vand.u32 15, %v49_v34  ;;  %v161_v55 = vand.u32 15, %v51_v54  ;;  %v2941_v0 = vld [vmem:[%s5011_s5 + $0x60] sm:$0xff]  ;;  %v2944_v3 = vld [vmem:[%s5011_s5 + $0x78] sm:$0xff] }
 0x124   :  { %v3539_v7 = vpack.c.bf16 %v2942_v38, %v2941_v0  ;;  %v3543_v8 = vpack.c.bf16 %v2944_v3, %v2943_v10 }
 0x125   :  { %vm4390_vm0 = vcmp.eq.s32.totalorder %v133_v35, 15  ;;  %vm4401_vm5 = vcmp.eq.s32.totalorder %v147_v53, 15 }
 0x126   :  { %3276 = vmatmul.mubr.msk.f32.gmra.mrb[4].mxu1 %vm829_vm4, %v4152_v24  ;;  %v715_v24 = vsel %vm4293_vm10, 0.0, %v4184_v2  ;;  %v817_v1 = vsel %vm4401_vm5, 0.0, %v4257_v62 }
 0x127   :  { %3278 = vmatprep.mubr.msk.f32.mxu1 %vm829_vm4, %v713_v18  ;;  %v1694_v18 = vld [vmem:[%s5011_s5 + $0x8] sm:$0xff] }
 0x128   :  { %v4453_v42 = vpack.c.bf16 %v1694_v18, %v1693_v11 }
 0x12a   :  { %3279 = vmatmul.mubr.msk.f32.gmra.mrb[6].mxu1 %vm829_vm4, %v4169_v58  ;;  %v717_v58 = vsel %vm4304_vm11, 0.0, %v4202_v14  ;;  %v721_v14 = vsel %vm4325_vm13, 0.0, %v655_v59  ;;  %v2937_v59 = vld [vmem:[%s5011_s5 + $0x40] sm:$0xff] }
 0x12b   :  { %3281 = vmatprep.mubr.msk.f32.mxu1 %vm829_vm4, %v715_v24 }
 0x12e   :  { %3282 = vmatmul.mubr.msk.f32.gmra.mrb[8].mxu1 %vm829_vm4, %v4187_v27 }
 0x12f   :  { %3284 = vmatprep.mubr.msk.f32.mxu1 %vm829_vm4, %v717_v58 }
 0x132   :  { %3285 = vmatmul.mubr.msk.f32.gmra.mrb[10].mxu1 %vm829_vm4, %v4205_v44 }
 0x133   :  { %3287 = vmatprep.mubr.msk.f32.mxu1 %vm829_vm4, %v719_v17 }
 0x136   :  { %3288 = vmatmul.mubr.msk.f32.gmra.mrb[12].mxu1 %vm829_vm4, %v653_v41  ;;  %v91_v41 = vand.u32 15, %v41_v31 }
 0x137   :  { %3290 = vmatprep.mubr.msk.f32.mxu1 %vm829_vm4, %v721_v14 }
 0x138   :  { %vm4357_vm1 = vcmp.eq.s32.totalorder %v91_v41, 15 }
 0x139   :  { %v5047_v20 = vsel %vm4357_vm1, 4294967295, %v5046_v20 }
 0x13a   :  { %3291 = vmatmul.mubr.msk.f32.gmra.mrb[14].mxu1 %vm829_vm4, %v657_v61  ;;  %v2938_v61 = vld [vmem:[%s5011_s5 + $0x48] sm:$0xff] }
 0x13b   :  { %3301 = vmatprep.mubr.msk.f32.mxu1 %vm829_vm4, %v4119_v56  ;;  %v807_v56 = vsel %vm4346_vm15, 0.0, %v4156_v33  ;;  %v5048_v33 = vmov 0  ;;  %v3531_v62 = vpack.c.bf16 %v2938_v61, %v2937_v59 }
 0x13c   :  { %v5049_v33 = vsel %vm4368_vm2, 4294967295, %v5048_v33 }
 0x13d   :  { %3532 = vmatprep.subr.bf16.mxu0 %v3531_v62 }
 0x13e   :  { %3302 = vmatmul.mubr.msk.f32.vlgmr.msra.gmra.mrb[0].mxu1 %vm829_vm4, %v805_v39  ;;  %3534 = vmatpush3.bf16.msra.mxu0 %v3531_v62 }
 0x13f   :  { %3304 = vmatprep.mubr.msk.f32.mxu1 %vm829_vm4, %v4146_v21  ;;  %v809_v21 = vsel %vm4357_vm1, 0.0, %v4173_v57  ;;  %v5050_v57 = vmov 0 }
 0x140   :  { %v5051_v57 = vsel %vm4379_vm3, 4294967295, %v5050_v57 }
 0x142   :  { %3305 = vmatmul.mubr.msk.f32.gmra.mrb[2].mxu1 %vm829_vm4, %v807_v56 }
 0x143   :  { %3307 = vmatprep.mubr.msk.f32.mxu1 %vm829_vm4, %v4159_v37  ;;  %v811_v37 = vsel %vm4368_vm2, 0.0, %v4190_v5  ;;  %v5052_v5 = vmov 0 }
 0x144   :  { %v5053_v5 = vsel %vm4390_vm0, 4294967295, %v5052_v5 }
 0x146   :  { %3308 = vmatmul.mubr.msk.f32.gmra.mrb[4].mxu1 %vm829_vm4, %v809_v21 }
 0x147   :  { %3310 = vmatprep.mubr.msk.f32.mxu1 %vm829_vm4, %v4177_v60  ;;  %v813_v60 = vsel %vm4379_vm3, 0.0, %v4208_v19  ;;  %v5054_v19 = vmov 0  ;;  %vm4411_vm3 = vcmp.eq.s32.totalorder %v161_v55, 15 }
 0x148   :  { %v5055_v19 = vsel %vm4401_vm5, 4294967295, %v5054_v19 }
 0x14a   :  { %3311 = vmatmul.mubr.msk.f32.gmra.mrb[6].mxu1 %vm829_vm4, %v811_v37 }
 0x14b   :  { %3313 = vmatprep.mubr.msk.f32.mxu1 %vm829_vm4, %v4194_v9  ;;  %v815_v9 = vsel %vm4390_vm0, 0.0, %v4222_v32  ;;  %vm5058_vm0 = vcmask 1046528  }
 0x14c   :  { %v771_v32 = vsel %vm5058_vm0, %v753_v50, 0.0  ;;  %v2940_v50 = vld [vmem:[%s5011_s5 + $0x58] sm:$0xff]  ;;  %vm1710_vm0 = vcmask 523264  }
 0x14e   :  { %3314 = vmatmul.mubr.msk.f32.gmra.mrb[8].mxu1 %vm829_vm4, %v813_v60 }
 0x14f   :  { %3316 = vmatprep.mubr.msk.f32.mxu1 %vm829_vm4, %v4211_v22  ;;  %v5056_v22 = vmov 0 }
 0x150   :  { %v5057_v22 = vsel %vm4411_vm3, 4294967295, %v5056_v22 }
 0x152   :  { %3317 = vmatmul.mubr.msk.f32.gmra.mrb[10].mxu1 %vm829_vm4, %v815_v9 }
 0x153   :  { %3319 = vmatprep.mubr.msk.f32.mxu1 %vm829_vm4, %v4233_v28  ;;  %v819_v28 = vsel %vm4411_vm3, 0.0, %v771_v32 }
 0x156   :  { %3320 = vmatmul.mubr.msk.f32.gmra.mrb[12].mxu1 %vm829_vm4, %v817_v1 }
 0x157   :  { %3322 = vmatprep.mubr.msk.f32.mxu1 %vm829_vm4, %v4262_v63  ;;  %v3535_v63 = vpack.c.bf16 %v2940_v50, %v2939_v30 }
 0x159   :  { %3536 = vmatprep.subr.bf16.mxu0 %v3535_v63 }
 0x15a   :  { %3323 = vmatmul.mubr.msk.f32.gmra.mrb[14].mxu1 %vm829_vm4, %v819_v28  ;;  %3538 = vmatpush3.bf16.msra.mxu0 %v3535_v63  ;;  %vm5059_vm4 = vcmask 1046528  }
 0x15b   :  { %3540 = vmatprep.subr.bf16.mxu0 %v3539_v7 }
 0x15e   :  { %3542 = vmatpush3.bf16.msra.mxu0 %v3539_v7 }
 0x15f   :  { %3544 = vmatprep.subr.bf16.mxu0 %v3543_v8 }
 0x162   :  { %3546 = vmatpush3.bf16.msra.mxu0 %v3543_v8 }
 0x163   :  { %3548 = vmatprep.subr.bf16.mxu0 %v4453_v42 }
 0x211   :  { %v3303_v24 = vpop.f32.mrb[0].mxu1 }
 0x212   :  { %v4462_v12 = vadd.f32 %v3303_v24, %v4459_v6  ;;  %v1319_v13 = vpop.f32.mrb[1].mxu1 }
 0x213   :  { %v4465_v58 = vadd.f32 %v4459_v6, %v1319_v13 }
 0x214   :  { %v2922_v15 = vmul.f32 -1.442695, %v4462_v12 }
 0x215   :  { %v2921_v17 = vmul.f32 -1.442695, %v4465_v58  ;;  %v3306_v25 = vpop.f32.mrb[2].mxu1 }
 0x216   :  { %3743 = vpow2.f32 %v2922_v15  ;;  %v4470_v14 = vadd.f32 %v3306_v25, %v4459_v6  ;;  %v1329_v26 = vpop.f32.mrb[3].mxu1 }
 0x217   :  { %3745 = vpow2.f32 %v2921_v17  ;;  %v4473_v16 = vadd.f32 %v4459_v6, %v1329_v26 }
 0x218   :  { %v2924_v48 = vmul.f32 -1.442695, %v4470_v14 }
 0x219   :  { %v2923_v31 = vmul.f32 -1.442695, %v4473_v16  ;;  %v3309_v39 = vpop.f32.mrb[4].mxu1 }
 0x21a   :  { %3747 = vpow2.f32 %v2924_v48  ;;  %v4478_v41 = vadd.f32 %v3309_v39, %v4459_v6  ;;  %v1339_v43 = vpop.f32.mrb[5].mxu1 }
 0x21b   :  { %3749 = vpow2.f32 %v2923_v31  ;;  %v4481_v56 = vadd.f32 %v4459_v6, %v1339_v43 }
 0x21c   :  { %v2926_v29 = vmul.f32 -1.442695, %v4478_v41 }
 0x21d   :  { %v2925_v46 = vmul.f32 -1.442695, %v4481_v56  ;;  %v3312_v21 = vpop.f32.mrb[6].mxu1 }
 0x21e   :  { %3751 = vpow2.f32 %v2926_v29  ;;  %v4486_v47 = vadd.f32 %v3312_v21, %v4459_v6  ;;  %v1349_v49 = vpop.f32.mrb[7].mxu1  ;;  %v1695_v21 = vld [vmem:[%s5011_s5 + $0x10] sm:$0xff] }
 0x21f   :  { %3753 = vpow2.f32 %v2925_v46  ;;  %v4489_v37 = vadd.f32 %v4459_v6, %v1349_v49  ;;  %v1696_v49 = vld [vmem:[%s5011_s5 + $0x18] sm:$0xff] }
 0x220   :  { %v3744_v35 = vpop.eup %3743  ;;  %v2928_v34 = vmul.f32 -1.442695, %v4486_v47 }
 0x221   :  { %v3746_v60 = vpop.eup %3745  ;;  %v1486_v53 = vadd.f32 1.0, %v3744_v35  ;;  %v2927_v54 = vmul.f32 -1.442695, %v4489_v37  ;;  %v3315_v9 = vpop.f32.mrb[8].mxu1 }
 0x222   :  { %v1485_v55 = vadd.f32 1.0, %v3746_v60  ;;  %3755 = vpow2.f32 %v2928_v34  ;;  %v4494_v1 = vadd.f32 %v3315_v9, %v4459_v6  ;;  %v1359_v32 = vpop.f32.mrb[9].mxu1 }
 0x223   :  { %3757 = vrcp.f32 %v1486_v53  ;;  %v4497_v28 = vadd.f32 %v4459_v6, %v1359_v32 }
 0x224   :  { %v3748_v59 = vpop.eup %3747  ;;  %3759 = vrcp.f32 %v1485_v55  ;;  %v2930_v61 = vmul.f32 -1.442695, %v4494_v1 }
 0x225   :  { %v3750_v62 = vpop.eup %3749  ;;  %v1488_v30 = vadd.f32 1.0, %v3748_v59  ;;  %3761 = vpow2.f32 %v2927_v54  ;;  %v2929_v50 = vmul.f32 -1.442695, %v4497_v28  ;;  %v3318_v63 = vpop.f32.mrb[10].mxu1 }
 0x226   :  { %v1487_v0 = vadd.f32 1.0, %v3750_v62  ;;  %3763 = vpow2.f32 %v2930_v61  ;;  %v4502_v38 = vadd.f32 %v3318_v63, %v4459_v6  ;;  %v1369_v7 = vpop.f32.mrb[11].mxu1  ;;  %v1697_v62 = vld [vmem:[%s5011_s5 + $0x20] sm:$0xff] }
 0x227   :  { %3765 = vrcp.f32 %v1488_v30  ;;  %v4505_v10 = vadd.f32 %v4459_v6, %v1369_v7  ;;  %v1698_v30 = vld [vmem:[%s5011_s5 + $0x28] sm:$0xff] }
 0x228   :  { %v3752_v3 = vpop.eup %3751  ;;  %3767 = vrcp.f32 %v1487_v0  ;;  %v2932_v8 = vmul.f32 -1.442695, %v4502_v38 }
 0x229   :  { %v3754_v11 = vpop.eup %3753  ;;  %v1490_v18 = vadd.f32 1.0, %v3752_v3  ;;  %3769 = vpow2.f32 %v2929_v50  ;;  %v2931_v24 = vmul.f32 -1.442695, %v4505_v10  ;;  %v3321_v13 = vpop.f32.mrb[12].mxu1 }
 0x22a   :  { %v1489_v15 = vadd.f32 1.0, %v3754_v11  ;;  %3771 = vpow2.f32 %v2932_v8  ;;  %v4510_v17 = vadd.f32 %v3321_v13, %v4459_v6  ;;  %v1379_v25 = vpop.f32.mrb[13].mxu1 }
 0x22b   :  { %3773 = vrcp.f32 %v1490_v18  ;;  %v4513_v26 = vadd.f32 %v4459_v6, %v1379_v25 }
 0x22c   :  { %v3756_v48 = vpop.eup %3755  ;;  %3775 = vrcp.f32 %v1489_v15  ;;  %v2934_v31 = vmul.f32 -1.442695, %v4510_v17 }
 0x22d   :  { %v3758_v39 = vpop.eup %3757  ;;  %v1492_v43 = vadd.f32 1.0, %v3756_v48  ;;  %3777 = vpow2.f32 %v2931_v24  ;;  %v2933_v29 = vmul.f32 -1.442695, %v4513_v26  ;;  %v3324_v46 = vpop.f32.mrb[14].mxu1  ;;  %v3555_v48 = vpack.c.bf16 %v1698_v30, %v1697_v62 }
 0x22e   :  { %v3760_v35 = vpop.eup %3759  ;;  %v4524_v34 = vmul.f32 %v3758_v39, %v4462_v12  ;;  %3779 = vpow2.f32 %v2934_v31  ;;  %v4527_v60 = vadd.f32 %v3324_v46, %v4459_v6  ;;  %v1389_v53 = vpop.f32.mrb[15].mxu1  ;;  %v3551_v12 = vpack.c.bf16 %v1696_v49, %v1695_v21 }
 0x22f   :  { %v3762_v54 = vpop.eup %3761  ;;  %v4530_v9 = vmul.f32 %v3760_v35, %v4465_v58  ;;  %3781 = vrcp.f32 %v1492_v43  ;;  %v4533_v55 = vadd.f32 %v4459_v6, %v1389_v53 }
 0x230   :  { %v3764_v32 = vpop.eup %3763  ;;  %v1630_v59 = vrot.slane %v4524_v34, 1  ;;  %v1491_v61 = vadd.f32 1.0, %v3762_v54  ;;  %3783 = vpow2.f32 %v2933_v29  ;;  %v2936_v6 = vmul.f32 -1.442695, %v4527_v60  ;;  %v1700_v29 = vld [vmem:[%s5011_s5 + $0x38] sm:$0xff] }
 0x231   :  { %v3766_v58 = vpop.eup %3765  ;;  %v1629_v50 = vrot.slane %v4530_v9, 1  ;;  %v1494_v63 = vadd.f32 1.0, %v3764_v32  ;;  %v2935_v0 = vmul.f32 -1.442695, %v4533_v55  ;;  %3341 = vmatprep.mubr.msk.f32.mxu0 %vm1710_vm0, %v4530_v9  ;;  %v1566_v3 = vrot.slane %v4524_v34, 7 }
 0x232   :  { %v3768_v7 = vpop.eup %3767  ;;  %v4549_v8 = vmul.f32 %v3766_v58, %v4470_v14  ;;  %3785 = vrcp.f32 %v1491_v61  ;;  %3342 = vmatmul.mubr.msk.f32.vlgmr.msra.gmra.mrb[16].mxu0 %vm1710_vm0, %v4524_v34  ;;  %v1565_v11 = vrot.slane %v4530_v9, 7  ;;  %v2980_v9 = vld [vmem:[%s5011_s5 + $0x98] sm:$0xff] }
 0x233   :  { %v3770_v18 = vpop.eup %3769  ;;  %v1535_v24 = vmul.f32 %v3768_v7, %v4473_v16  ;;  %3787 = vrcp.f32 %v1494_v63  ;;  %3550 = vmatpush3.bf16.msra.mxu0 %v4453_v42  ;;  %v4559_v13 = vsel %vm5059_vm4, %v1629_v50, %v1630_v59  ;;  %v1699_v42 = vld [vmem:[%s5011_s5 + $0x30] sm:$0xff]  ;;  %vm5060_vm4 = vcmask 1040384  }
 0x234   :  { %v3772_v15 = vpop.eup %3771  ;;  %v1570_v14 = vrot.slane %v4549_v8, 7  ;;  %v1493_v25 = vadd.f32 1.0, %v3770_v18  ;;  %3789 = vpow2.f32 %v2936_v6  ;;  %3552 = vmatprep.subr.bf16.mxu0 %v3551_v12  ;;  %v1634_v39 = vrot.slane %v4549_v8, 1  ;;  %vm5061_vm3 = vmmov %vm5060_vm4 }
 0x235   :  { %v3774_v31 = vpop.eup %3773  ;;  %v1568_v43 = vrot.slane %v1535_v24, 7  ;;  %v1496_v16 = vadd.f32 1.0, %v3772_v15  ;;  %3791 = vpow2.f32 %v2935_v0  ;;  %3344 = vmatprep.mubr.msk.f32.mxu0 %vm1710_vm0, %v1535_v24  ;;  %v1632_v21 = vrot.slane %v1535_v24, 1  ;;  %vm5064_vm2 = vmmov %vm5061_vm3 }
 0x236   :  { %v3776_v46 = vpop.eup %3775  ;;  %v4571_v49 = vmul.f32 %v3774_v31, %v4478_v41  ;;  %3793 = vrcp.f32 %v1493_v25  ;;  %3345 = vmatmul.mubr.msk.f32.gmra.mrb[18].mxu0 %vm1710_vm0, %v4549_v8  ;;  %v4578_v35 = vsel %vm5060_vm4, %v1565_v11, %v1566_v3  ;;  %v3559_v58 = vpack.c.bf16 %v1700_v29, %v1699_v42 }
 0x237   :  { %v3778_v53 = vpop.eup %3777  ;;  %v1537_v54 = vmul.f32 %v3776_v46, %v4481_v56  ;;  %3795 = vrcp.f32 %v1496_v16  ;;  %3554 = vmatpush3.bf16.msra.mxu0 %v3551_v12  ;;  %v4582_v32 = vsel %vm5061_vm3, %v1566_v3, %v1568_v43  ;;  %v2977_v56 = vld [vmem:[%s5011_s5 + $0x80] sm:$0xff]  ;;  %v2978_v12 = vld [vmem:[%s5011_s5 + $0x88] sm:$0xff]  ;;  %v4594_v7 = vsel %vm5061_vm3, %v1568_v43, %v1570_v14 }
 0x238   :  { %v3780_v61 = vpop.eup %3779  ;;  %v1574_v41 = vrot.slane %v4571_v49, 7  ;;  %v1638_v62 = vrot.slane %v4571_v49, 1  ;;  %v1495_v30 = vadd.f32 1.0, %v3778_v53  ;;  %3556 = vmatprep.subr.bf16.mxu0 %v3555_v48  ;;  %vm5062_vm4 = vcmask 1046528  }
 0x239   :  { %v3782_v50 = vpop.eup %3781  ;;  %v1572_v63 = vrot.slane %v1537_v54, 7  ;;  %v1636_v6 = vrot.slane %v1537_v54, 1  ;;  %v1498_v0 = vadd.f32 1.0, %v3780_v61  ;;  %3347 = vmatprep.mubr.msk.f32.mxu0 %vm1710_vm0, %v1537_v54  ;;  %v4602_v18 = vsel %vm5062_vm4, %v1630_v59, %v1632_v21  ;;  %vm5063_vm5 = vmmov %vm5062_vm4 }
 0x23a   :  { %v3784_v3 = vpop.eup %3783  ;;  %v1540_v8 = vmul.f32 %v3782_v50, %v4486_v47  ;;  %3797 = vrcp.f32 %v1495_v30  ;;  %3348 = vmatmul.mubr.msk.f32.gmra.mrb[20].mxu0 %vm1710_vm0, %v4571_v49  ;;  %v4605_v24 = vsel %vm5063_vm5, %v1632_v21, %v1634_v39  ;;  %v4613_v16 = vpack.c.bf16 %v2978_v12, %v2977_v56  ;;  %vm5065_vm5 = vmmov %vm5062_vm4 }
 0x23b   :  { %3799 = vrcp.f32 %v1498_v0  ;;  %v1497_v15 = vadd.f32 1.0, %v3784_v3  ;;  %3558 = vmatpush3.bf16.msra.mxu0 %v3555_v48  ;;  %v4608_v25 = vsel %vm5061_vm3, %v1570_v14, %v1572_v63  ;;  %v4611_v47 = vsel %vm5064_vm2, %v1572_v63, %v1574_v41  ;;  %vm5066_vm3 = vmmov %vm5064_vm2 }
 0x23c   :  { %v3786_v31 = vpop.eup %3785  ;;  %v1578_v43 = vrot.slane %v1540_v8, 7  ;;  %3560 = vmatprep.subr.bf16.mxu0 %v3559_v58  ;;  %v4617_v42 = vsel %vm5065_vm5, %v1634_v39, %v1636_v6  ;;  %v4620_v48 = vsel %vm5062_vm4, %v1636_v6, %v1638_v62  ;;  %v1642_v21 = vrot.slane %v1540_v8, 1  ;;  %vm5067_vm5 = vmmov %vm5062_vm4 }
 0x23d   :  { %v3788_v34 = vpop.eup %3787  ;;  %v1539_v59 = vmul.f32 %v3786_v31, %v4489_v37  ;;  %3801 = vrcp.f32 %v1497_v15  ;;  %v1617_v51 = vsel %vm4271_vm8, 0.0, %v4608_v25  ;;  %v1678_v52 = vsel %vm4335_vm14, 0.0, %v4602_v18 }
 0x23e   :  { %v3790_v14 = vpop.eup %3789  ;;  %v1542_v29 = vmul.f32 %v3788_v34, %v4494_v1  ;;  %v1680_v2 = vsel %vm4346_vm15, 0.0, %v4617_v42  ;;  %vm5082_vm8 = vnez %v5051_v57  ;;  %vm2804_vm14 = vcmask 1041409  }
 0x23f   :  { %v3792_v46 = vpop.eup %3791  ;;  %v1576_v49 = vrot.slane %v1539_v59, 7  ;;  %v1640_v53 = vrot.slane %v1539_v59, 1  ;;  %v1500_v54 = vadd.f32 1.0, %v3790_v14  ;;  %3350 = vmatprep.mubr.msk.f32.mxu0 %vm1710_vm0, %v1539_v59  ;;  %3562 = vmatpush3.bf16.msra.mxu0 %v3559_v58  ;;  %vm2807_vm15 = vcmask 1042434  }
 0x240   :  { %v3794_v61 = vpop.eup %3793  ;;  %v1582_v37 = vrot.slane %v1542_v29, 7  ;;  %v1499_v30 = vadd.f32 1.0, %v3792_v46  ;;  %3351 = vmatmul.mubr.msk.f32.gmra.mrb[22].mxu0 %vm1710_vm0, %v1540_v8  ;;  %3564 = vmatprep.subr.bf16.mxu0 %v4613_v16  ;;  %v1646_v6 = vrot.slane %v1542_v29, 1 }
 0x241   :  { %v3796_v39 = vpop.eup %3795  ;;  %v1541_v50 = vmul.f32 %v3794_v61, %v4497_v28  ;;  %3803 = vrcp.f32 %v1500_v54  ;;  %v4628_v1 = vsel %vm5064_vm2, %v1574_v41, %v1576_v49  ;;  %v4631_v63 = vsel %vm5066_vm3, %v1576_v49, %v1578_v43  ;;  %vm5068_vm3 = vmmov %vm5064_vm2 }
 0x242   :  { %v1544_v58 = vmul.f32 %v3796_v39, %v4502_v38  ;;  %3805 = vrcp.f32 %v1499_v30  ;;  %v4635_v0 = vsel %vm5067_vm5, %v1638_v62, %v1640_v53  ;;  %v4639_v28 = vsel %vm5062_vm4, %v1640_v53, %v1642_v21  ;;  %vm5069_vm5 = vmmov %vm5062_vm4 }
 0x243   :  { %v1580_v56 = vrot.slane %v1541_v50, 7  ;;  %v1644_v12 = vrot.slane %v1541_v50, 1  ;;  %3353 = vmatprep.mubr.msk.f32.mxu0 %vm1710_vm0, %v1541_v50 }
 0x244   :  { %v3798_v3 = vpop.eup %3797  ;;  %v1586_v41 = vrot.slane %v1544_v58, 7  ;;  %v1650_v8 = vrot.slane %v1544_v58, 1  ;;  %3354 = vmatmul.mubr.msk.f32.gmra.mrb[24].mxu0 %vm1710_vm0, %v1542_v29 }
 0x245   :  { %v3800_v15 = vpop.eup %3799  ;;  %v1543_v31 = vmul.f32 %v3798_v3, %v4505_v10  ;;  %v4644_v38 = vsel %vm5064_vm2, %v1578_v43, %v1580_v56  ;;  %v4647_v62 = vsel %vm5068_vm3, %v1580_v56, %v1582_v37  ;;  %v4650_v34 = vsel %vm5069_vm5, %v1642_v21, %v1644_v12  ;;  %vm5070_vm3 = vmmov %vm5064_vm2 }
 0x246   :  { %v1546_v59 = vmul.f32 %v3800_v15, %v4510_v17  ;;  %v4654_v14 = vsel %vm5062_vm4, %v1644_v12, %v1646_v6  ;;  %vm5071_vm5 = vmmov %vm5062_vm4  ;;  %v1621_v4 = vsel %vm4293_vm10, 0.0, %v4644_v38  ;;  %vm5084_vm10 = vnez %v5055_v19  ;;  %v2435_v19 = vld [vmem:[%s5013_s7 + $0x8] sm:$0xff] }
 0x247   :  { %v3802_v46 = vpop.eup %3801  ;;  %v1584_v49 = vrot.slane %v1543_v31, 7  ;;  %v1648_v29 = vrot.slane %v1543_v31, 1  ;;  %3356 = vmatprep.mubr.msk.f32.mxu0 %vm1710_vm0, %v1543_v31 }
 0x248   :  { %v1590_v10 = vrot.slane %v1546_v59, 7  ;;  %v1654_v53 = vrot.slane %v1546_v59, 1  ;;  %v1545_v43 = vmul.f32 %v3802_v46, %v4513_v26  ;;  %3357 = vmatmul.mubr.msk.f32.gmra.mrb[26].mxu0 %vm1710_vm0, %v1544_v58 }
 0x249   :  { %v1585_v54 = vsel %vm5064_vm2, %v1582_v37, %v1584_v49  ;;  %v1587_v21 = vsel %vm5070_vm3, %v1584_v49, %v1586_v41  ;;  %v4662_v17 = vsel %vm5071_vm5, %v1646_v6, %v1648_v29  ;;  %v4665_v61 = vsel %vm5062_vm4, %v1648_v29, %v1650_v8  ;;  %vm5072_vm3 = vmmov %vm5064_vm2 }
 0x24a   :  { %v1588_v30 = vrot.slane %v1545_v43, 7  ;;  %v1652_v39 = vrot.slane %v1545_v43, 1  ;;  %3359 = vmatprep.mubr.msk.f32.mxu0 %vm1710_vm0, %v1545_v43  ;;  %vm5073_vm5 = vmmov %vm5062_vm4  ;;  %v1623_v36 = vsel %vm4304_vm11, 0.0, %v1585_v54  ;;  %v1686_v40 = vsel %vm5082_vm8, 0.0, %v4662_v17  ;;  %v2446_v54 = vld [vmem:[%s5013_s7 + $0x60] sm:$0xff] }
 0x24b   :  { %v3804_v50 = vpop.eup %3803  ;;  %vm5074_vm4 = vmmov %vm5064_vm2 }
 0x24c   :  { %v3806_v56 = vpop.eup %3805  ;;  %v4669_v26 = vmul.f32 %v3804_v50, %v4527_v60  ;;  %3360 = vmatmul.mubr.msk.f32.gmra.mrb[28].mxu0 %vm1710_vm0, %v1546_v59  ;;  %v1589_v37 = vsel %vm5064_vm2, %v1586_v41, %v1588_v30  ;;  %v1591_v58 = vsel %vm5072_vm3, %v1588_v30, %v1590_v10  ;;  %v4675_v6 = vsel %vm5073_vm5, %v1650_v8, %v1652_v39  ;;  %vm5075_vm1 = vmmov %vm5073_vm5  ;;  %v2979_v8 = vld [vmem:[%s5011_s5 + $0x90] sm:$0xff]  ;;  %v2981_v30 = vld [vmem:[%s5011_s5 + $0xa0] sm:$0xff] }
 0x24d   :  { %v1547_v12 = vmul.f32 %v3806_v56, %v4533_v55  ;;  %v1612_v3 = vsel %vm5074_vm4, 0.0, %v1565_v11  ;;  %v4682_v15 = vsel %vm5075_vm1, %v1652_v39, %v1654_v53  ;;  %vm5076_vm1 = vmmov %vm5064_vm2  ;;  %v3567_v43 = vpack.c.bf16 %v2980_v9, %v2979_v8  ;;  %v2983_v39 = vld [vmem:[%s5011_s5 + $0xb0] sm:$0xff]  ;;  %v2984_v50 = vld [vmem:[%s5011_s5 + $0xb8] sm:$0xff] }
 0x24e   :  { %v1594_v60 = vrot.slane %v4669_v26, 7  ;;  %v1658_v31 = vrot.slane %v4669_v26, 1  ;;  %v1613_v55 = vsel %vm4225_vm6, 0.0, %v1612_v3  ;;  %vm5077_vm2 = vmmov %vm5076_vm1  ;;  %vm5080_vm6 = vnez %v5047_v20  ;;  %v2449_v56 = vld [vmem:[%s5013_s7 + $0x78] sm:$0xff] }
 0x24f   :  { %v1592_v59 = vrot.slane %v1547_v12, 7  ;;  %v1656_v41 = vrot.slane %v1547_v12, 1  ;;  %3362 = vmatprep.mubr.msk.f32.mxu0 %vm1710_vm0, %v1547_v12  ;;  %vm5078_vm3 = vmmov %vm5073_vm5  ;;  %v1682_v27 = vsel %vm5080_vm6, 0.0, %v4635_v0  ;;  %v2442_v0 = vld [vmem:[%s5013_s7 + $0x40] sm:$0xff]  ;;  %vm2813_vm4 = vcmask 1044484  }
 0x250   :  { %3363 = vmatmul.mubr.msk.f32.gmra.mrb[30].mxu0 %vm1710_vm0, %v4669_v26  ;;  %vm5079_vm5 = vmmov %vm5078_vm3 }
 0x251   :  { %3381 = vmatprep.mubr.msk.f32.mxu0 %vm1710_vm0, %v1613_v55  ;;  %v1593_v11 = vsel %vm5076_vm1, %v1590_v10, %v1592_v59  ;;  %v1595_v46 = vsel %vm5077_vm2, %v1592_v59, %v1594_v60  ;;  %v1657_v49 = vsel %vm5078_vm3, %v1654_v53, %v1656_v41  ;;  %v1659_v29 = vsel %vm5079_vm5, %v1656_v41, %v1658_v31  ;;  %vm5085_vm11 = vmmov %vm5078_vm3 }
 0x252   :  { %v1615_v10 = vsel %vm4248_vm7, 0.0, %v4582_v32  ;;  %v3571_v53 = vpack.c.bf16 %v2982_v45, %v2981_v30  ;;  %v1619_v32 = vsel %vm4282_vm9, 0.0, %v4628_v1  ;;  %v1627_v23 = vsel %vm4325_vm13, 0.0, %v1593_v11  ;;  %v2441_v1 = vld [vmem:[%s5013_s7 + $0x38] sm:$0xff] }
 0x253   :  { %vm5081_vm7 = vnez %v5049_v33  ;;  %vm5083_vm9 = vnez %v5053_v5  ;;  %v1690_v33 = vsel %vm5084_vm10, 0.0, %v1657_v49  ;;  %v1676_v57 = vsel %vm5085_vm11, %v1658_v31, 0.0 }
 0x254   :  { %3382 = vmatmul.mubr.msk.f32.vlgmr.msra.gmra.mrb[16].mxu0 %vm1710_vm0, %v4578_v35  ;;  %v3575_v35 = vpack.c.bf16 %v2984_v50, %v2983_v39  ;;  %v1684_v44 = vsel %vm5081_vm7, 0.0, %v4650_v34  ;;  %v1688_v20 = vsel %vm5083_vm9, 0.0, %v4675_v6  ;;  %v2445_v34 = vld [vmem:[%s5013_s7 + $0x58] sm:$0xff]  ;;  %vm2707_vm13 = vcmask 15360  }
 0x255   :  { %3566 = vmatpush3.bf16.msra.mxu0 %v4613_v16  ;;  %3384 = vmatprep.mubr.msk.f32.mxu0 %vm1710_vm0, %v1615_v10  ;;  %v2439_v16 = vld [vmem:[%s5013_s7 + $0x28] sm:$0xff]  ;;  %vm2816_vm1 = vcmask 1045509   ;;  %vm2819_vm2 = vcmask 1046534   ;;  %vm2822_vm3 = vcmask 1047559  }
 0x256   :  { %3568 = vmatprep.subr.bf16.mxu0 %v3567_v43 }
 0x258   :  { %3385 = vmatmul.mubr.msk.f32.gmra.mrb[18].mxu0 %vm1710_vm0, %v4594_v7  ;;  %v1625_v7 = vsel %vm4315_vm12, 0.0, %v1589_v37  ;;  %vm5086_vm12 = vnez %v5057_v22  ;;  %v2437_v22 = vld [vmem:[%s5013_s7 + $0x18] sm:$0xff]  ;;  %v3872_v37 = vmov 0  }
 0x259   :  { %3387 = vmatprep.mubr.msk.f32.mxu0 %vm1710_vm0, %v1617_v51  ;;  %3570 = vmatpush3.bf16.msra.mxu0 %v3567_v43  ;;  %v1692_v5 = vsel %vm5086_vm12, 0.0, %v1676_v57 }
 0x25a   :  { %3572 = vmatprep.subr.bf16.mxu0 %v3571_v53  ;;  %3677 = vset.pattern.permute.xlu1 %v3872_v37 }
 0x25b   :  { %3678 = vset.pattern.permute.xlu0 %v3872_v37 }
 0x25c   :  { %3388 = vmatmul.mubr.msk.f32.gmra.mrb[20].mxu0 %vm1710_vm0, %v4611_v47  ;;  %v2438_v47 = vld [vmem:[%s5013_s7 + $0x20] sm:$0xff] }
 0x25d   :  { %3390 = vmatprep.mubr.msk.f32.mxu0 %vm1710_vm0, %v1619_v32  ;;  %3574 = vmatpush3.bf16.msra.mxu0 %v3571_v53  ;;  %v3587_v42 = vpack.c.bf16 %v2439_v16, %v2438_v47 }
 0x25e   :  { %3576 = vmatprep.subr.bf16.mxu0 %v3575_v35 }
 0x260   :  { %3391 = vmatmul.mubr.msk.f32.gmra.mrb[22].mxu0 %vm1710_vm0, %v4631_v63 }
 0x261   :  { %3393 = vmatprep.mubr.msk.f32.mxu0 %vm1710_vm0, %v1621_v4  ;;  %3578 = vmatpush3.bf16.msra.mxu0 %v3575_v35 }
 0x264   :  { %3394 = vmatmul.mubr.msk.f32.gmra.mrb[24].mxu0 %vm1710_vm0, %v4647_v62  ;;  %v2444_v62 = vld [vmem:[%s5013_s7 + $0x50] sm:$0xff] }
 0x265   :  { %3396 = vmatprep.mubr.msk.f32.mxu0 %vm1710_vm0, %v1623_v36 }
 0x268   :  { %3397 = vmatmul.mubr.msk.f32.gmra.mrb[26].mxu0 %vm1710_vm0, %v1587_v21  ;;  %v2447_v21 = vld [vmem:[%s5013_s7 + $0x68] sm:$0xff] }
 0x269   :  { %3399 = vmatprep.mubr.msk.f32.mxu0 %vm1710_vm0, %v1625_v7  ;;  %v3603_v17 = vpack.c.bf16 %v2447_v21, %v2446_v54 }
 0x26c   :  { %3400 = vmatmul.mubr.msk.f32.gmra.mrb[28].mxu0 %vm1710_vm0, %v1591_v58  ;;  %v4854_v58 = vld [vmem:[%s5014_s6] ss:$0 sm:$0xff] }
 0x26d   :  { %3402 = vmatprep.mubr.msk.f32.mxu0 %vm1710_vm0, %v1627_v23 }
 0x270   :  { %3403 = vmatmul.mubr.msk.f32.gmra.mrb[30].mxu0 %vm1710_vm0, %v1595_v46 }
 0x271   :  { %3421 = vmatprep.mubr.msk.f32.mxu0 %vm1710_vm0, %v4559_v13  ;;  %v2434_v13 = vld [vmem:[%s5013_s7] sm:$0xff] }
 0x272   :  { %v3579_v18 = vpack.c.bf16 %v2435_v19, %v2434_v13 }
 0x274   :  { %3422 = vmatmul.mubr.msk.f32.vlgmr.msra.gmra.mrb[16].mxu0 %vm1710_vm0, %v1678_v52  ;;  %3580 = vmatprep.subr.bf16.mxu1 %v3579_v18 }
 0x275   :  { %3424 = vmatprep.mubr.msk.f32.mxu0 %vm1710_vm0, %v4605_v24  ;;  %3582 = vmatpush3.bf16.msra.mxu1 %v3579_v18  ;;  %v2436_v24 = vld [vmem:[%s5013_s7 + $0x10] sm:$0xff] }
 0x276   :  { %v3583_v25 = vpack.c.bf16 %v2437_v22, %v2436_v24 }
 0x278   :  { %3425 = vmatmul.mubr.msk.f32.gmra.mrb[18].mxu0 %vm1710_vm0, %v1680_v2  ;;  %3584 = vmatprep.subr.bf16.mxu1 %v3583_v25 }
 0x279   :  { %3427 = vmatprep.mubr.msk.f32.mxu0 %vm1710_vm0, %v4620_v48  ;;  %3586 = vmatpush3.bf16.msra.mxu1 %v3583_v25  ;;  %v2440_v48 = vld [vmem:[%s5013_s7 + $0x30] sm:$0xff] }
 0x27a   :  { %3588 = vmatprep.subr.bf16.mxu1 %v3587_v42  ;;  %v3591_v63 = vpack.c.bf16 %v2441_v1, %v2440_v48 }
 0x27c   :  { %3428 = vmatmul.mubr.msk.f32.gmra.mrb[20].mxu0 %vm1710_vm0, %v1682_v27 }
 0x27d   :  { %3430 = vmatprep.mubr.msk.f32.mxu0 %vm1710_vm0, %v4639_v28  ;;  %3590 = vmatpush3.bf16.msra.mxu1 %v3587_v42  ;;  %v2443_v28 = vld [vmem:[%s5013_s7 + $0x48] sm:$0xff] }
 0x27e   :  { %3592 = vmatprep.subr.bf16.mxu1 %v3591_v63  ;;  %v3595_v38 = vpack.c.bf16 %v2443_v28, %v2442_v0 }
 0x280   :  { %3431 = vmatmul.mubr.msk.f32.gmra.mrb[22].mxu0 %vm1710_vm0, %v1684_v44 }
 0x281   :  { %3433 = vmatprep.mubr.msk.f32.mxu0 %vm1710_vm0, %v4654_v14  ;;  %3594 = vmatpush3.bf16.msra.mxu1 %v3591_v63  ;;  %v3599_v14 = vpack.c.bf16 %v2445_v34, %v2444_v62 }
 0x282   :  { %3596 = vmatprep.subr.bf16.mxu1 %v3595_v38 }
 0x284   :  { %3434 = vmatmul.mubr.msk.f32.gmra.mrb[24].mxu0 %vm1710_vm0, %v1686_v40 }
 0x285   :  { %3436 = vmatprep.mubr.msk.f32.mxu0 %vm1710_vm0, %v4665_v61  ;;  %3598 = vmatpush3.bf16.msra.mxu1 %v3595_v38  ;;  %v2448_v61 = vld [vmem:[%s5013_s7 + $0x70] sm:$0xff] }
 0x286   :  { %3600 = vmatprep.subr.bf16.mxu1 %v3599_v14  ;;  %v3607_v26 = vpack.c.bf16 %v2449_v56, %v2448_v61 }
 0x288   :  { %3437 = vmatmul.mubr.msk.f32.gmra.mrb[26].mxu0 %vm1710_vm0, %v1688_v20 }
 0x289   :  { %3439 = vmatprep.mubr.msk.f32.mxu0 %vm1710_vm0, %v4682_v15  ;;  %3602 = vmatpush3.bf16.msra.mxu1 %v3599_v14 }
 0x28a   :  { %3604 = vmatprep.subr.bf16.mxu1 %v3603_v17 }
 0x28c   :  { %3440 = vmatmul.mubr.msk.f32.gmra.mrb[28].mxu0 %vm1710_vm0, %v1690_v33 }
 0x28d   :  { %3442 = vmatprep.mubr.msk.f32.mxu0 %vm1710_vm0, %v1659_v29  ;;  %3606 = vmatpush3.bf16.msra.mxu1 %v3603_v17 }
 0x28e   :  { %3608 = vmatprep.subr.bf16.mxu1 %v3607_v26 }
 0x290   :  { %3443 = vmatmul.mubr.msk.f32.gmra.mrb[30].mxu0 %vm1710_vm0, %v1692_v5  ;;  %vm2810_vm0 = vcmask 1043459  }
 0x291   :  { %3610 = vmatpush3.bf16.msra.mxu1 %v3607_v26 }
 0x347   :  { %v3423_v6 = vpop.f32.mrb[16].mxu0 }
 0x348   :  { %v4857_v12 = vadd.f32 %v3423_v6, %v4854_v58  ;;  %v2204_v3 = vpop.f32.mrb[17].mxu0 }
 0x349   :  { %v4860_v15 = vadd.f32 %v4854_v58, %v2204_v3 }
 0x34a   :  { %v3003_v60 = vmul.f32 -1.442695, %v4857_v12 }
 0x34b   :  { %v3002_v31 = vmul.f32 -1.442695, %v4860_v15  ;;  %v3426_v59 = vpop.f32.mrb[18].mxu0 }
 0x34c   :  { %3807 = vpow2.f32 %v3003_v60  ;;  %v4865_v41 = vadd.f32 %v3426_v59, %v4854_v58  ;;  %v2214_v8 = vpop.f32.mrb[19].mxu0 }
 0x34d   :  { %3809 = vpow2.f32 %v3002_v31  ;;  %v4868_v9 = vadd.f32 %v4854_v58, %v2214_v8 }
 0x34e   :  { %v3005_v55 = vmul.f32 -1.442695, %v4865_v41 }
 0x34f   :  { %v3004_v11 = vmul.f32 -1.442695, %v4868_v9  ;;  %v3429_v46 = vpop.f32.mrb[20].mxu0 }
 0x350   :  { %3811 = vpow2.f32 %v3005_v55  ;;  %v4873_v49 = vadd.f32 %v3429_v46, %v4854_v58  ;;  %v2224_v29 = vpop.f32.mrb[21].mxu0 }
 0x351   :  { %3813 = vpow2.f32 %v3004_v11  ;;  %v4876_v43 = vadd.f32 %v4854_v58, %v2224_v29 }
 0x352   :  { %v3007_v30 = vmul.f32 -1.442695, %v4873_v49 }
 0x353   :  { %v3006_v45 = vmul.f32 -1.442695, %v4876_v43  ;;  %v3432_v10 = vpop.f32.mrb[22].mxu0 }
 0x354   :  { %3815 = vpow2.f32 %v3007_v30  ;;  %v4881_v53 = vadd.f32 %v3432_v10, %v4854_v58  ;;  %v2234_v39 = vpop.f32.mrb[23].mxu0 }
 0x355   :  { %3817 = vpow2.f32 %v3006_v45  ;;  %v4884_v50 = vadd.f32 %v4854_v58, %v2234_v39 }
 0x356   :  { %v3808_v51 = vpop.eup %3807  ;;  %v3009_v35 = vmul.f32 -1.442695, %v4881_v53 }
 0x357   :  { %v3810_v32 = vpop.eup %3809  ;;  %v2371_v4 = vadd.f32 1.0, %v3808_v51  ;;  %v3008_v36 = vmul.f32 -1.442695, %v4884_v50  ;;  %v3435_v7 = vpop.f32.mrb[24].mxu0 }
 0x358   :  { %v2370_v23 = vadd.f32 1.0, %v3810_v32  ;;  %3819 = vpow2.f32 %v3009_v35  ;;  %v4889_v52 = vadd.f32 %v3435_v7, %v4854_v58  ;;  %v2244_v2 = vpop.f32.mrb[25].mxu0 }
 0x359   :  { %3821 = vrcp.f32 %v2371_v4  ;;  %v4892_v27 = vadd.f32 %v4854_v58, %v2244_v2 }
 0x35a   :  { %v3812_v44 = vpop.eup %3811  ;;  %3823 = vrcp.f32 %v2370_v23  ;;  %v3011_v40 = vmul.f32 -1.442695, %v4889_v52 }
 0x35b   :  { %v3814_v20 = vpop.eup %3813  ;;  %v2373_v33 = vadd.f32 1.0, %v3812_v44  ;;  %3825 = vpow2.f32 %v3008_v36  ;;  %v3010_v57 = vmul.f32 -1.442695, %v4892_v27  ;;  %v3438_v5 = vpop.f32.mrb[26].mxu0 }
 0x35c   :  { %v2372_v13 = vadd.f32 1.0, %v3814_v20  ;;  %3827 = vpow2.f32 %v3011_v40  ;;  %v4897_v19 = vadd.f32 %v3438_v5, %v4854_v58  ;;  %v2254_v18 = vpop.f32.mrb[27].mxu0 }
 0x35d   :  { %3829 = vrcp.f32 %v2373_v33  ;;  %v4900_v24 = vadd.f32 %v4854_v58, %v2254_v18 }
 0x35e   :  { %v3816_v22 = vpop.eup %3815  ;;  %3831 = vrcp.f32 %v2372_v13  ;;  %v3013_v25 = vmul.f32 -1.442695, %v4897_v19 }
 0x35f   :  { %v3818_v47 = vpop.eup %3817  ;;  %v2375_v16 = vadd.f32 1.0, %v3816_v22  ;;  %3833 = vpow2.f32 %v3010_v57  ;;  %v3012_v42 = vmul.f32 -1.442695, %v4900_v24  ;;  %v3441_v48 = vpop.f32.mrb[28].mxu0 }
 0x360   :  { %v2374_v1 = vadd.f32 1.0, %v3818_v47  ;;  %3835 = vpow2.f32 %v3013_v25  ;;  %v4905_v63 = vadd.f32 %v3441_v48, %v4854_v58  ;;  %v2264_v0 = vpop.f32.mrb[29].mxu0 }
 0x361   :  { %3837 = vrcp.f32 %v2375_v16  ;;  %v4908_v28 = vadd.f32 %v4854_v58, %v2264_v0 }
 0x362   :  { %v3820_v38 = vpop.eup %3819  ;;  %3839 = vrcp.f32 %v2374_v1  ;;  %v3015_v62 = vmul.f32 -1.442695, %v4905_v63 }
 0x363   :  { %v3822_v34 = vpop.eup %3821  ;;  %v2377_v14 = vadd.f32 1.0, %v3820_v38  ;;  %3841 = vpow2.f32 %v3012_v42  ;;  %v3014_v54 = vmul.f32 -1.442695, %v4908_v28  ;;  %v3444_v21 = vpop.f32.mrb[30].mxu0 }
 0x364   :  { %v3824_v17 = vpop.eup %3823  ;;  %3843 = vpow2.f32 %v3015_v62  ;;  %v4913_v61 = vadd.f32 %v3444_v21, %v4854_v58  ;;  %v2274_v56 = vpop.f32.mrb[31].mxu0  ;;  %v2419_v60 = vmul.f32 %v3822_v34, %v4857_v12 }
 0x365   :  { %v3826_v26 = vpop.eup %3825  ;;  %v2418_v37 = vmul.f32 %v3824_v17, %v4860_v15  ;;  %v4917_v6 = vadd.f32 %v4854_v58, %v2274_v56  ;;  %3845 = vpow2.f32 %v3014_v54 }
 0x366   :  { %v3828_v3 = vpop.eup %3827  ;;  %v2376_v31 = vadd.f32 1.0, %v3826_v26  ;;  %v3017_v59 = vmul.f32 -1.442695, %v4913_v61  ;;  %3847 = vrcp.f32 %v2377_v14 }
 0x367   :  { %v3830_v8 = vpop.eup %3829  ;;  %v2379_v55 = vadd.f32 1.0, %v3828_v3  ;;  %v3016_v11 = vmul.f32 -1.442695, %v4917_v6  ;;  %3477 = vmatprep.mubr.f32.mxu1 %v2418_v37 }
 0x368   :  { %v3832_v46 = vpop.eup %3831  ;;  %3849 = vrcp.f32 %v2376_v31  ;;  %3478 = vmatmul.mubr.f32.vlgmr.msra.gmra.mrb[16].mxu1 %v2419_v60  ;;  %v2421_v12 = vmul.f32 %v3830_v8, %v4865_v41  ;;  %v2598_v31 = vld [vmem:[%s5015_s8 + $0x18] sm:$0xff]  ;;  %v2597_v8 = vld [vmem:[%s5015_s8 + $0x10] sm:$0xff] }
 0x369   :  { %v3834_v15 = vpop.eup %3833  ;;  %v2420_v58 = vmul.f32 %v3832_v46, %v4868_v9  ;;  %3851 = vrcp.f32 %v2379_v55  ;;  %v2596_v55 = vld [vmem:[%s5015_s8 + $0x8] sm:$0xff] }
 0x36a   :  { %v3836_v29 = vpop.eup %3835  ;;  %v2378_v30 = vadd.f32 1.0, %v3834_v15  ;;  %3853 = vpow2.f32 %v3017_v59  ;;  %v2600_v15 = vld [vmem:[%s5015_s8 + $0x28] sm:$0xff] }
 0x36b   :  { %v3838_v45 = vpop.eup %3837  ;;  %v2381_v10 = vadd.f32 1.0, %v3836_v29  ;;  %3855 = vpow2.f32 %v3016_v11  ;;  %3480 = vmatprep.mubr.f32.mxu1 %v2420_v58  ;;  %v2595_v11 = vld [vmem:[%s5015_s8] sm:$0xff] }
 0x36c   :  { %v3840_v39 = vpop.eup %3839  ;;  %3857 = vrcp.f32 %v2378_v30  ;;  %3481 = vmatmul.mubr.f32.gmra.mrb[18].mxu1 %v2421_v12  ;;  %v2423_v4 = vmul.f32 %v3838_v45, %v4873_v49  ;;  %v2599_v30 = vld [vmem:[%s5015_s8 + $0x20] sm:$0xff] }
 0x36d   :  { %v3842_v51 = vpop.eup %3841  ;;  %v2422_v35 = vmul.f32 %v3840_v39, %v4876_v43  ;;  %3859 = vrcp.f32 %v2381_v10 }
 0x36e   :  { %v3844_v32 = vpop.eup %3843  ;;  %v2380_v9 = vadd.f32 1.0, %v3842_v51 }
 0x36f   :  { %v2383_v36 = vadd.f32 1.0, %v3844_v32  ;;  %3483 = vmatprep.mubr.f32.mxu1 %v2422_v35  ;;  %v3846_v41 = vpop.eup %3845 }
 0x370   :  { %3861 = vrcp.f32 %v2380_v9  ;;  %3484 = vmatmul.mubr.f32.gmra.mrb[20].mxu1 %v2423_v4  ;;  %v3848_v7 = vpop.eup %3847  ;;  %v2382_v23 = vadd.f32 1.0, %v3846_v41  ;;  %v2602_v41 = vld [vmem:[%s5015_s8 + $0x38] sm:$0xff] }
 0x371   :  { %3863 = vrcp.f32 %v2383_v36  ;;  %v2425_v43 = vmul.f32 %v3848_v7, %v4881_v53  ;;  %v2601_v36 = vld [vmem:[%s5015_s8 + $0x30] sm:$0xff] }
 0x372   :  { %v3850_v2 = vpop.eup %3849  ;;  %3865 = vrcp.f32 %v2382_v23 }
 0x373   :  { %v3852_v44 = vpop.eup %3851  ;;  %v2424_v40 = vmul.f32 %v3850_v2, %v4884_v50 }
 0x374   :  { %v3854_v20 = vpop.eup %3853  ;;  %v2427_v18 = vmul.f32 %v3852_v44, %v4889_v52 }
 0x375   :  { %v3856_v33 = vpop.eup %3855  ;;  %v2385_v49 = vadd.f32 1.0, %v3854_v20  ;;  %3486 = vmatprep.mubr.f32.mxu1 %v2424_v40 }
 0x376   :  { %v3858_v57 = vpop.eup %3857  ;;  %v2384_v5 = vadd.f32 1.0, %v3856_v33  ;;  %3487 = vmatmul.mubr.f32.gmra.mrb[22].mxu1 %v2425_v43 }
 0x377   :  { %v2426_v13 = vmul.f32 %v3858_v57, %v4892_v27  ;;  %3867 = vrcp.f32 %v2385_v49  ;;  %v3860_v22 = vpop.eup %3859 }
 0x378   :  { %3869 = vrcp.f32 %v2384_v5  ;;  %v2429_v53 = vmul.f32 %v3860_v22, %v4897_v19  ;;  %v2603_v5 = vld [vmem:[%s5015_s8 + $0x40] sm:$0xff]  ;;  %v2604_v22 = vld [vmem:[%s5015_s8 + $0x48] sm:$0xff] }
 0x379   :  { %3489 = vmatprep.mubr.f32.mxu1 %v2426_v13 }
 0x37a   :  { %v3862_v25 = vpop.eup %3861  ;;  %3490 = vmatmul.mubr.f32.gmra.mrb[24].mxu1 %v2427_v18 }
 0x37b   :  { %v2428_v50 = vmul.f32 %v3862_v25, %v4900_v24  ;;  %v3864_v47 = vpop.eup %3863 }
 0x37c   :  { %v3866_v16 = vpop.eup %3865  ;;  %v2431_v27 = vmul.f32 %v3864_v47, %v4905_v63 }
 0x37d   :  { %3492 = vmatprep.mubr.f32.mxu1 %v2428_v50  ;;  %v2430_v42 = vmul.f32 %v3866_v16, %v4908_v28 }
 0x37e   :  { %3493 = vmatmul.mubr.f32.gmra.mrb[26].mxu1 %v2429_v53 }
 0x37f   :  { %3495 = vmatprep.mubr.f32.mxu1 %v2430_v42 }
 0x381   :  { %v3868_v48 = vpop.eup %3867 }
 0x382   :  { %v3870_v52 = vpop.eup %3869  ;;  %3496 = vmatmul.mubr.f32.gmra.mrb[28].mxu1 %v2431_v27  ;;  %v2433_v0 = vmul.f32 %v3868_v48, %v4913_v61 }
 0x383   :  { %v2432_v1 = vmul.f32 %v3870_v52, %v4917_v6 }
 0x385   :  { %3498 = vmatprep.mubr.f32.mxu1 %v2432_v1  ;;  %v2605_v1 = vld [vmem:[%s5015_s8 + $0x50] sm:$0xff] }
 0x386   :  { %3499 = vmatmul.mubr.f32.gmra.mrb[30].mxu1 %v2433_v0 }
 0x43b   :  { %v3479_v24 = vpop.f32.mrb[16].mxu1 }
 0x43c   :  { %2618 = vperm.xlu1 %3677, %v3479_v24   ;;  %v2516_v19 = vpop.f32.mrb[17].mxu1 }
 0x43d   :  { %2613 = vperm.xlu0 %3678, %v2516_v19   ;;  %v2606_v19 = vld [vmem:[%s5015_s8 + $0x58] sm:$0xff] }
 0x43f   :  { %v3482_v38 = vpop.f32.mrb[18].mxu1 }
 0x440   :  { %v2526_v62 = vpop.f32.mrb[19].mxu1 }
 0x441   :  { %2628 = vperm.xlu0 %3678, %v3482_v38  }
 0x443   :  { %v3485_v28 = vpop.f32.mrb[20].mxu1 }
 0x444   :  { %2638 = vperm.xlu1 %3677, %v3485_v28   ;;  %v2536_v63 = vpop.f32.mrb[21].mxu1 }
 0x445   :  { %2623 = vperm.xlu0 %3678, %v2526_v62  }
 0x448   :  { %2633 = vperm.xlu1 %3677, %v2536_v63  }
 0x449   :  { %v3488_v34 = vpop.f32.mrb[22].mxu1 }
 0x44a   :  { %v2546_v14 = vpop.f32.mrb[23].mxu1 }
 0x44b   :  { %2643 = vperm.xlu0 %3678, %v2546_v14  }
 0x44c   :  { %2648 = vperm.xlu1 %3677, %v3488_v34  }
 0x44d   :  { %v3491_v54 = vpop.f32.mrb[24].mxu1 }
 0x44e   :  { %v2556_v21 = vpop.f32.mrb[25].mxu1 }
 0x44f   :  { %2653 = vperm.xlu0 %3678, %v2556_v21  }
 0x450   :  { %2658 = vperm.xlu1 %3677, %v3491_v54  }
 0x451   :  { %v3494_v17 = vpop.f32.mrb[26].mxu1 }
 0x452   :  { %v2566_v61 = vpop.f32.mrb[27].mxu1 }
 0x453   :  { %2663 = vperm.xlu0 %3678, %v2566_v61  }
 0x454   :  { %2668 = vperm.xlu1 %3677, %v3494_v17  }
 0x455   :  { %v3497_v56 = vpop.f32.mrb[28].mxu1 }
 0x456   :  { %v2576_v26 = vpop.f32.mrb[29].mxu1 }
 0x457   :  { %2673 = vperm.xlu0 %3678, %v2576_v26  }
 0x458   :  { %2678 = vperm.xlu1 %3677, %v3497_v56  }
 0x459   :  { %v3500_v37 = vpop.f32.mrb[30].mxu1 }
 0x45a   :  { %v2586_v6 = vpop.f32.mrb[31].mxu1 }
 0x45b   :  { %2683 = vperm.xlu0 %3678, %v2586_v6   ;;  %v2607_v6 = vld [vmem:[%s5015_s8 + $0x60] sm:$0xff] }
 0x45c   :  { %2688 = vperm.xlu1 %3677, %v3500_v37  }
 0x4bb   :  { %v2619_v60 = vpop.permute.xlu1 %2618 }
 0x4bc   :  { %v2614_v3 = vpop.permute.xlu0 %2613  ;;  %v2692_v45 = vmul.f32 %v2619_v60, %v2596_v55 }
 0x4bd   :  { %v2691_v10 = vmul.f32 %v2614_v3, %v2595_v11  ;;  %v2608_v3 = vld [vmem:[%s5015_s8 + $0x68] sm:$0xff] }
 0x4be   :  { %v2709_v7 = vsel %vm2707_vm13, %v2692_v45, 0.0 }
 0x4bf   :  { %v2708_v23 = vsel %vm2707_vm13, %v2691_v10, 0.0 }
 0x4c0   :  { %v2629_v59 = vpop.permute.xlu0 %2628  ;;  %v2710_v13 = vadd.f32 %v2709_v7, %v2708_v23 }
 0x4c1   :  { %v2694_v46 = vmul.f32 %v2629_v59, %v2598_v31 }
 0x4c2   :  { %v2711_v0 = vrot.slane %v2710_v13, 4 }
 0x4c3   :  { %v2639_v58 = vpop.permute.xlu1 %2638  ;;  %v2718_v51 = vsel %vm2707_vm13, %v2694_v46, 0.0 }
 0x4c4   :  { %v2624_v29 = vpop.permute.xlu0 %2623  ;;  %v2696_v39 = vmul.f32 %v2639_v58, %v2600_v15  ;;  %v2712_v56 = vadd.f32 %v2711_v0, %v2710_v13 }
 0x4c5   :  { %v2693_v12 = vmul.f32 %v2624_v29, %v2597_v8 }
 0x4c6   :  { %v2727_v2 = vsel %vm2707_vm13, %v2696_v39, 0.0  ;;  %v2609_v39 = vld [vmem:[%s5015_s8 + $0x70] sm:$0xff] }
 0x4c7   :  { %v2717_v35 = vsel %vm2707_vm13, %v2693_v12, 0.0  ;;  %v2634_v32 = vpop.permute.xlu1 %2633  ;;  %v2713_v12 = vrot.slane %v2712_v56, 2 }
 0x4c8   :  { %v2719_v4 = vadd.f32 %v2718_v51, %v2717_v35  ;;  %v2695_v9 = vmul.f32 %v2634_v32, %v2599_v30  ;;  %v2610_v51 = vld [vmem:[%s5015_s8 + $0x78] sm:$0xff] }
 0x4ca   :  { %v2726_v44 = vsel %vm2707_vm13, %v2695_v9, 0.0  ;;  %v2644_v40 = vpop.permute.xlu0 %2643  ;;  %v2720_v20 = vrot.slane %v2719_v4, 4 }
 0x4cb   :  { %v2728_v43 = vadd.f32 %v2727_v2, %v2726_v44  ;;  %v2697_v33 = vmul.f32 %v2644_v40, %v2601_v36  ;;  %v2649_v49 = vpop.permute.xlu1 %2648 }
 0x4cc   :  { %v2698_v57 = vmul.f32 %v2649_v49, %v2602_v41  ;;  %v2721_v53 = vadd.f32 %v2720_v20, %v2719_v4  ;;  %v2714_v20 = vadd.f32 %v2713_v12, %v2712_v56 }
 0x4cd   :  { %v2729_v18 = vrot.slane %v2728_v43, 4  ;;  %v2735_v25 = vsel %vm2707_vm13, %v2697_v33, 0.0 }
 0x4ce   :  { %v2736_v50 = vsel %vm2707_vm13, %v2698_v57, 0.0  ;;  %v2654_v47 = vpop.permute.xlu0 %2653  ;;  %v2722_v63 = vrot.slane %v2721_v53, 2 }
 0x4cf   :  { %v2737_v16 = vadd.f32 %v2736_v50, %v2735_v25  ;;  %v2699_v42 = vmul.f32 %v2654_v47, %v2603_v5  ;;  %v2659_v27 = vpop.permute.xlu1 %2658  ;;  %v2730_v48 = vadd.f32 %v2729_v18, %v2728_v43 }
 0x4d0   :  { %v2700_v52 = vmul.f32 %v2659_v27, %v2604_v22  ;;  %v2723_v8 = vadd.f32 %v2722_v63, %v2721_v53  ;;  %v2715_v53 = vrot.slane %v2714_v20, 1 }
 0x4d1   :  { %v2738_v24 = vrot.slane %v2737_v16, 4  ;;  %v2744_v38 = vsel %vm2707_vm13, %v2699_v42, 0.0  ;;  %v2731_v17 = vrot.slane %v2730_v48, 2 }
 0x4d2   :  { %v2745_v62 = vsel %vm2707_vm13, %v2700_v52, 0.0  ;;  %v2664_v28 = vpop.permute.xlu0 %2663  ;;  %v2724_v4 = vrot.slane %v2723_v8, 1 }
 0x4d3   :  { %v2739_v34 = vadd.f32 %v2738_v24, %v2737_v16  ;;  %v2746_v14 = vadd.f32 %v2745_v62, %v2744_v38  ;;  %v2701_v54 = vmul.f32 %v2664_v28, %v2605_v1  ;;  %v2669_v21 = vpop.permute.xlu1 %2668  ;;  %v2732_v15 = vadd.f32 %v2731_v17, %v2730_v48  ;;  %v3018_v48 = vld [vmem:[%s5016_s9] ss:$0 sm:$0xff] }
 0x4d4   :  { %v2702_v61 = vmul.f32 %v2669_v21, %v2606_v19  ;;  %v2725_v18 = vadd.f32 %v2724_v4, %v2723_v8  ;;  %v2716_v28 = vadd.f32 %v2715_v53, %v2714_v20 }
 0x4d5   :  { %v2740_v26 = vrot.slane %v2739_v34, 2  ;;  %v2747_v37 = vrot.slane %v2746_v14, 4  ;;  %v2753_v60 = vsel %vm2707_vm13, %v2701_v54, 0.0  ;;  %v2733_v23 = vrot.slane %v2732_v15, 1 }
 0x4d6   :  { %v2754_v31 = vsel %vm2707_vm13, %v2702_v61, 0.0  ;;  %v2674_v59 = vpop.permute.xlu0 %2673  ;;  %v2788_v0 = vadd.f32 %v3018_v48, %v2725_v18 }
 0x4d7   :  { %v2748_v55 = vadd.f32 %v2747_v37, %v2746_v14  ;;  %v2755_v11 = vadd.f32 %v2754_v31, %v2753_v60  ;;  %v2679_v46 = vpop.permute.xlu1 %2678  ;;  %v2703_v58 = vmul.f32 %v2674_v59, %v2607_v6  ;;  %v2741_v30 = vadd.f32 %v2740_v26, %v2739_v34 }
 0x4d8   :  { %v2704_v29 = vmul.f32 %v2679_v46, %v2608_v3  ;;  %v2734_v50 = vadd.f32 %v2733_v23, %v2732_v15  ;;  %v2803_v21 = vrot.slane %v2788_v0, 7  ;;  %v2787_v37 = vadd.f32 %v3018_v48, %v2716_v28 }
 0x4d9   :  { %v2749_v45 = vrot.slane %v2748_v55, 2  ;;  %v2756_v10 = vrot.slane %v2755_v11, 4  ;;  %v2762_v41 = vsel %vm2707_vm13, %v2703_v58, 0.0  ;;  %v2742_v43 = vrot.slane %v2741_v30, 1 }
 0x4da   :  { %v2763_v35 = vsel %vm2707_vm13, %v2704_v29, 0.0  ;;  %v2684_v32 = vpop.permute.xlu0 %2683  ;;  %v2789_v38 = vadd.f32 %v3018_v48, %v2734_v50  ;;  %v2805_v59 = vsel %vm2804_vm14, %v2803_v21, %v2787_v37 }
 0x4db   :  { %v2750_v9 = vadd.f32 %v2749_v45, %v2748_v55  ;;  %v2757_v36 = vadd.f32 %v2756_v10, %v2755_v11  ;;  %v2689_v7 = vpop.permute.xlu1 %2688  ;;  %v2764_v2 = vadd.f32 %v2763_v35, %v2762_v41  ;;  %v2705_v44 = vmul.f32 %v2684_v32, %v2609_v39 }
 0x4dc   :  { %v2706_v40 = vmul.f32 %v2689_v7, %v2610_v51  ;;  %v2743_v16 = vadd.f32 %v2742_v43, %v2741_v30  ;;  %v2806_v56 = vrot.slane %v2789_v38, 6 }
 0x4dd   :  { %v2758_v33 = vrot.slane %v2757_v36, 2  ;;  %v2751_v49 = vrot.slane %v2750_v9, 1  ;;  %v2765_v57 = vrot.slane %v2764_v2, 4  ;;  %v2771_v5 = vsel %vm2707_vm13, %v2705_v44, 0.0 }
 0x4de   :  { %v2772_v13 = vsel %vm2707_vm13, %v2706_v40, 0.0  ;;  %v2790_v63 = vadd.f32 %v3018_v48, %v2743_v16  ;;  %v2808_v11 = vsel %vm2807_vm15, %v2806_v56, %v2805_v59 }
 0x4df   :  { %v2759_v22 = vadd.f32 %v2758_v33, %v2757_v36  ;;  %v2773_v25 = vadd.f32 %v2772_v13, %v2771_v5  ;;  %v2766_v47 = vadd.f32 %v2765_v57, %v2764_v2  ;;  %v2752_v52 = vadd.f32 %v2751_v49, %v2750_v9 }
 0x4e0   :  { %v2809_v6 = vrot.slane %v2790_v63, 5 }
 0x4e1   :  { %v2760_v42 = vrot.slane %v2759_v22, 1  ;;  %v2774_v27 = vrot.slane %v2773_v25, 4  ;;  %v2767_v1 = vrot.slane %v2766_v47, 2  ;;  %v2791_v14 = vadd.f32 %v3018_v48, %v2752_v52 }
 0x4e2   :  { %v2811_v15 = vsel %vm2810_vm0, %v2809_v6, %v2808_v11 }
 0x4e3   :  { %v2761_v24 = vadd.f32 %v2760_v42, %v2759_v22  ;;  %v2775_v19 = vadd.f32 %v2774_v27, %v2773_v25  ;;  %v2768_v62 = vadd.f32 %v2767_v1, %v2766_v47  ;;  %v2812_v60 = vrot.slane %v2791_v14, 4 }
 0x4e5   :  { %v2776_v34 = vrot.slane %v2775_v19, 2  ;;  %v2769_v54 = vrot.slane %v2768_v62, 1  ;;  %v2792_v17 = vadd.f32 %v3018_v48, %v2761_v24  ;;  %v2814_v29 = vsel %vm2813_vm4, %v2812_v60, %v2811_v15 }
 0x4e7   :  { %v2777_v61 = vadd.f32 %v2776_v34, %v2775_v19  ;;  %v2770_v26 = vadd.f32 %v2769_v54, %v2768_v62  ;;  %v2815_v8 = vrot.slane %v2792_v17, 3 }
 0x4e9   :  { %v2778_v3 = vrot.slane %v2777_v61, 1  ;;  %v2793_v31 = vadd.f32 %v3018_v48, %v2770_v26  ;;  %v2817_v12 = vsel %vm2816_vm1, %v2815_v8, %v2814_v29 }
 0x4eb   :  { %v2779_v55 = vadd.f32 %v2778_v3, %v2777_v61  ;;  %v2818_v46 = vrot.slane %v2793_v31, 2 }
 0x4ed   :  { %v2794_v58 = vadd.f32 %v3018_v48, %v2779_v55  ;;  %v2820_v45 = vsel %vm2819_vm2, %v2818_v46, %v2817_v12 }
 0x4ef   :  { %v2821_v30 = vrot.slane %v2794_v58, 1 }
 0x4f1   :  { %v2823_v10 = vsel %vm2822_vm3, %v2821_v30, %v2820_v45 }
 0x4f2   :  { %2825 = vst.msk [vmem:[%s5017_s10] sm:$0xff] %vm2707_vm13, %v2823_v10 }

</bundles_post_ra>
